<compile_context>
chip_gen: v5e
topology: v5e:2x2
jax: 0.10.0
libtpu: 0.0.40
codegen_flags: <defaults>
</compile_context>

<pallas_src>
import jax
import jax.numpy as jnp
from jax.experimental import pallas as pl
from jax.experimental.pallas import tpu as pltpu


def _conv3x3_lrelu_kernel(x_ref, w_ref, b_ref, o_ref, xp_ref):
    # x_ref : (1, H, W, C_in)        one NHWC image
    # w_ref : (3, 3, C_in, C_out)    HWIO weights (same block every step)
    # b_ref : (1, C_out)             bias
    # o_ref : (1, H, W, C_out)       NHWC output image
    # xp_ref: (H+2, W+2, C_in)       VMEM scratch, zero-padded copy of image
    _, H, W, C_in = x_ref.shape
    C_out = o_ref.shape[3]

    # Fused zero-padding in VMEM (padded array never touches HBM).
    xp_ref[...] = jnp.zeros_like(xp_ref)
    xp_ref[1:H + 1, 1:W + 1, :] = x_ref[0]

    # 3x3 conv = 9 shifted (H*W, C_in) @ (C_in, C_out) MXU matmuls, f32 acc.
    acc = jnp.zeros((H * W, C_out), jnp.float32)
    for ky in range(3):
        for kx in range(3):
            tap = xp_ref[ky:ky + H, kx:kx + W, :].reshape(H * W, C_in)
            acc = acc + jnp.dot(tap, w_ref[ky, kx],
                                preferred_element_type=jnp.float32)

    acc = acc + b_ref[...].astype(jnp.float32)          # (H*W,Co) + (1,Co)
    acc = jnp.where(acc >= 0, acc, 0.2 * acc)            # leaky_relu(0.2)
    o_ref[0] = acc.reshape(H, W, C_out).astype(o_ref.dtype)


def conv_bn_leaky_relu2d(x, weight, bias):
    """Forward of ConvBnLeakyRelu2d: leaky_relu(conv2d(x, weight, bias), 0.2).

    x:      (N, C_in, H, W)  float32 (NCHW, as PyTorch)
    weight: (C_out, C_in, 3, 3)      (OIHW, as PyTorch)
    bias:   (C_out,)
    returns (N, C_out, H, W)
    """
    N, C_in, H, W = x.shape
    C_out = weight.shape[0]

    # Channels-last (lane-dense) internal layout.
    x_nhwc = jnp.transpose(x, (0, 2, 3, 1))          # (N, H, W, C_in)
    w_hwio = jnp.transpose(weight, (2, 3, 1, 0))     # (3, 3, C_in, C_out)
    b2 = bias.reshape(1, C_out)

    out_nhwc = pl.pallas_call(
        _conv3x3_lrelu_kernel,
        out_shape=jax.ShapeDtypeStruct((N, H, W, C_out), x.dtype),
        grid=(N,),
        in_specs=[
            pl.BlockSpec((1, H, W, C_in), lambda n: (n, 0, 0, 0)),
            pl.BlockSpec((3, 3, C_in, C_out), lambda n: (0, 0, 0, 0)),
            pl.BlockSpec((1, C_out), lambda n: (0, 0)),
        ],
        out_specs=pl.BlockSpec((1, H, W, C_out), lambda n: (n, 0, 0, 0)),
        scratch_shapes=[pltpu.VMEM((H + 2, W + 2, C_in), x.dtype)],
        compiler_params=pltpu.CompilerParams(
            dimension_semantics=("parallel",)),
    )(x_nhwc, w_hwio, b2)

    return jnp.transpose(out_nhwc, (0, 3, 1, 2))     # back to NCHW


def _conv_bn_lrelu_ref(x, weight, bias):
    """Pure-JAX reference matching PyTorch Conv2d(3,pad=1) + LeakyReLU(0.2)."""
    y = jax.lax.conv_general_dilated(
        x, weight, window_strides=(1, 1), padding=((1, 1), (1, 1)),
        dimension_numbers=("NCHW", "OIHW", "NCHW"))
    y = y + bias[None, :, None, None]
    return jnp.where(y >= 0, y, 0.2 * y)


if __name__ == "__main__":
    key = jax.random.PRNGKey(0)
    kx, kw, kb = jax.random.split(key, 3)

    N, C_in, C_out, H, W = 2, 4, 8, 16, 16
    x = jax.random.normal(kx, (N, C_in, H, W), dtype=jnp.float32)
    weight = 0.1 * jax.random.normal(kw, (C_out, C_in, 3, 3), dtype=jnp.float32)
    bias = 0.1 * jax.random.normal(kb, (C_out,), dtype=jnp.float32)

    y = jax.block_until_ready(conv_bn_leaky_relu2d(x, weight, bias))
    y_ref = jax.block_until_ready(_conv_bn_lrelu_ref(x, weight, bias))

    assert y.shape == (N, C_out, H, W)
    assert jnp.allclose(y, y_ref, atol=1e-4, rtol=1e-4)
    print("KERNEL_OK")
</pallas_src>

<mosaic_0001>
module attributes {stable_mosaic.version = 11 : i64} {
  func.func @_conv3x3_lrelu_kernel(%arg0: i32, %arg1: memref<1x16x16x4xf32, #tpu.memory_space<vmem>>, %arg2: memref<3x3x4x8xf32, #tpu.memory_space<vmem>>, %arg3: memref<1x8xf32, #tpu.memory_space<vmem>>, %arg4: memref<1x16x16x8xf32, #tpu.memory_space<vmem>>, %arg5: memref<18x18x4xf32, #tpu.memory_space<vmem>>) attributes {dimension_semantics = [#tpu.dimension_semantics<parallel>], iteration_bounds = array<i64: 2>, scalar_prefetch = 0 : i64, scratch_operands = 1 : i64, tpu.core_type = #tpu.core_type<tc>, window_params = [{transform_indices = @transform_0, window_bounds = array<i64: 1, 16, 16, 4>}, {pipeline_mode = #tpu.pipeline_mode<synchronous>, transform_indices = @transform_1, window_bounds = array<i64: 3, 3, 4, 8>}, {pipeline_mode = #tpu.pipeline_mode<synchronous>, transform_indices = @transform_2, window_bounds = array<i64: 1, 8>}, {transform_indices = @transform_3, window_bounds = array<i64: 1, 16, 16, 8>}]} {
    %cst = arith.constant 0.000000e+00 : f32
    %0 = vector.broadcast %cst : f32 to vector<18x18x4xf32>
    %c0 = arith.constant 0 : index
    %c0_0 = arith.constant 0 : index
    %c0_1 = arith.constant 0 : index
    %1 = vector.load %arg5[%c0, %c0_0, %c0_1] : memref<18x18x4xf32, #tpu.memory_space<vmem>>, vector<18x18x4xf32>
    tpu.vector_store %arg5[%c0, %c0_0, %c0_1], %0 {strides = array<i32>} : memref<18x18x4xf32, #tpu.memory_space<vmem>>, vector<18x18x4xf32>,
    %c0_2 = arith.constant 0 : index
    %c0_3 = arith.constant 0 : index
    %c0_4 = arith.constant 0 : index
    %c0_5 = arith.constant 0 : index
    %2 = vector.load %arg1[%c0_2, %c0_3, %c0_4, %c0_5] : memref<1x16x16x4xf32, #tpu.memory_space<vmem>>, vector<1x16x16x4xf32>
    %3 = vector.shape_cast %2 : vector<1x16x16x4xf32> to vector<16x16x4xf32>
    %c1 = arith.constant 1 : index
    %c1_6 = arith.constant 1 : index
    %c0_7 = arith.constant 0 : index
    %4 = vector.load %arg5[%c1, %c1_6, %c0_7] : memref<18x18x4xf32, #tpu.memory_space<vmem>>, vector<16x16x4xf32>
    tpu.vector_store %arg5[%c1, %c1_6, %c0_7], %3 {strides = array<i32>} : memref<18x18x4xf32, #tpu.memory_space<vmem>>, vector<16x16x4xf32>,
    %cst_8 = arith.constant 0.000000e+00 : f32
    %5 = vector.broadcast %cst_8 : f32 to vector<256x8xf32>
    %c0_9 = arith.constant 0 : index
    %c0_10 = arith.constant 0 : index
    %c0_11 = arith.constant 0 : index
    %6 = vector.load %arg5[%c0_9, %c0_10, %c0_11] : memref<18x18x4xf32, #tpu.memory_space<vmem>>, vector<16x16x4xf32>
    %7 = vector.shape_cast %6 : vector<16x16x4xf32> to vector<256x4xf32>
    %c0_12 = arith.constant 0 : index
    %c0_13 = arith.constant 0 : index
    %c0_14 = arith.constant 0 : index
    %c0_15 = arith.constant 0 : index
    %8 = vector.load %arg2[%c0_12, %c0_13, %c0_14, %c0_15] : memref<3x3x4x8xf32, #tpu.memory_space<vmem>>, vector<1x1x4x8xf32>
    %9 = vector.shape_cast %8 : vector<1x1x4x8xf32> to vector<4x8xf32>
    %cst_16 = arith.constant dense<0.000000e+00> : vector<256x8xf32>
    %10 = tpu.matmul %7, %9, %cst_16 {dimension_numbers = #tpu.dot_dimension_numbers<[1], [0], [0], [1], [0, 0, 1, 1], [], []>} : vector<256x4xf32>, vector<4x8xf32>, vector<256x8xf32> -> vector<256x8xf32>
    %11 = arith.addf %5, %10 : vector<256x8xf32>
    %c0_17 = arith.constant 0 : index
    %c1_18 = arith.constant 1 : index
    %c0_19 = arith.constant 0 : index
    %12 = vector.load %arg5[%c0_17, %c1_18, %c0_19] : memref<18x18x4xf32, #tpu.memory_space<vmem>>, vector<16x16x4xf32>
    %13 = vector.shape_cast %12 : vector<16x16x4xf32> to vector<256x4xf32>
    %c0_20 = arith.constant 0 : index
    %c1_21 = arith.constant 1 : index
    %c0_22 = arith.constant 0 : index
    %c0_23 = arith.constant 0 : index
    %14 = vector.load %arg2[%c0_20, %c1_21, %c0_22, %c0_23] : memref<3x3x4x8xf32, #tpu.memory_space<vmem>>, vector<1x1x4x8xf32>
    %15 = vector.shape_cast %14 : vector<1x1x4x8xf32> to vector<4x8xf32>
    %cst_24 = arith.constant dense<0.000000e+00> : vector<256x8xf32>
    %16 = tpu.matmul %13, %15, %cst_24 {dimension_numbers = #tpu.dot_dimension_numbers<[1], [0], [0], [1], [0, 0, 1, 1], [], []>} : vector<256x4xf32>, vector<4x8xf32>, vector<256x8xf32> -> vector<256x8xf32>
    %17 = arith.addf %11, %16 : vector<256x8xf32>
    %c0_25 = arith.constant 0 : index
    %c2 = arith.constant 2 : index
    %c0_26 = arith.constant 0 : index
    %18 = vector.load %arg5[%c0_25, %c2, %c0_26] : memref<18x18x4xf32, #tpu.memory_space<vmem>>, vector<16x16x4xf32>
    %19 = vector.shape_cast %18 : vector<16x16x4xf32> to vector<256x4xf32>
    %c0_27 = arith.constant 0 : index
    %c2_28 = arith.constant 2 : index
    %c0_29 = arith.constant 0 : index
    %c0_30 = arith.constant 0 : index
    %20 = vector.load %arg2[%c0_27, %c2_28, %c0_29, %c0_30] : memref<3x3x4x8xf32, #tpu.memory_space<vmem>>, vector<1x1x4x8xf32>
    %21 = vector.shape_cast %20 : vector<1x1x4x8xf32> to vector<4x8xf32>
    %cst_31 = arith.constant dense<0.000000e+00> : vector<256x8xf32>
    %22 = tpu.matmul %19, %21, %cst_31 {dimension_numbers = #tpu.dot_dimension_numbers<[1], [0], [0], [1], [0, 0, 1, 1], [], []>} : vector<256x4xf32>, vector<4x8xf32>, vector<256x8xf32> -> vector<256x8xf32>
    %23 = arith.addf %17, %22 : vector<256x8xf32>
    %c1_32 = arith.constant 1 : index
    %c0_33 = arith.constant 0 : index
    %c0_34 = arith.constant 0 : index
    %24 = vector.load %arg5[%c1_32, %c0_33, %c0_34] : memref<18x18x4xf32, #tpu.memory_space<vmem>>, vector<16x16x4xf32>
    %25 = vector.shape_cast %24 : vector<16x16x4xf32> to vector<256x4xf32>
    %c1_35 = arith.constant 1 : index
    %c0_36 = arith.constant 0 : index
    %c0_37 = arith.constant 0 : index
    %c0_38 = arith.constant 0 : index
    %26 = vector.load %arg2[%c1_35, %c0_36, %c0_37, %c0_38] : memref<3x3x4x8xf32, #tpu.memory_space<vmem>>, vector<1x1x4x8xf32>
    %27 = vector.shape_cast %26 : vector<1x1x4x8xf32> to vector<4x8xf32>
    %cst_39 = arith.constant dense<0.000000e+00> : vector<256x8xf32>
    %28 = tpu.matmul %25, %27, %cst_39 {dimension_numbers = #tpu.dot_dimension_numbers<[1], [0], [0], [1], [0, 0, 1, 1], [], []>} : vector<256x4xf32>, vector<4x8xf32>, vector<256x8xf32> -> vector<256x8xf32>
    %29 = arith.addf %23, %28 : vector<256x8xf32>
    %c1_40 = arith.constant 1 : index
    %c1_41 = arith.constant 1 : index
    %c0_42 = arith.constant 0 : index
    %30 = vector.load %arg5[%c1_40, %c1_41, %c0_42] : memref<18x18x4xf32, #tpu.memory_space<vmem>>, vector<16x16x4xf32>
    %31 = vector.shape_cast %30 : vector<16x16x4xf32> to vector<256x4xf32>
    %c1_43 = arith.constant 1 : index
    %c1_44 = arith.constant 1 : index
    %c0_45 = arith.constant 0 : index
    %c0_46 = arith.constant 0 : index
    %32 = vector.load %arg2[%c1_43, %c1_44, %c0_45, %c0_46] : memref<3x3x4x8xf32, #tpu.memory_space<vmem>>, vector<1x1x4x8xf32>
    %33 = vector.shape_cast %32 : vector<1x1x4x8xf32> to vector<4x8xf32>
    %cst_47 = arith.constant dense<0.000000e+00> : vector<256x8xf32>
    %34 = tpu.matmul %31, %33, %cst_47 {dimension_numbers = #tpu.dot_dimension_numbers<[1], [0], [0], [1], [0, 0, 1, 1], [], []>} : vector<256x4xf32>, vector<4x8xf32>, vector<256x8xf32> -> vector<256x8xf32>
    %35 = arith.addf %29, %34 : vector<256x8xf32>
    %c1_48 = arith.constant 1 : index
    %c2_49 = arith.constant 2 : index
    %c0_50 = arith.constant 0 : index
    %36 = vector.load %arg5[%c1_48, %c2_49, %c0_50] : memref<18x18x4xf32, #tpu.memory_space<vmem>>, vector<16x16x4xf32>
    %37 = vector.shape_cast %36 : vector<16x16x4xf32> to vector<256x4xf32>
    %c1_51 = arith.constant 1 : index
    %c2_52 = arith.constant 2 : index
    %c0_53 = arith.constant 0 : index
    %c0_54 = arith.constant 0 : index
    %38 = vector.load %arg2[%c1_51, %c2_52, %c0_53, %c0_54] : memref<3x3x4x8xf32, #tpu.memory_space<vmem>>, vector<1x1x4x8xf32>
    %39 = vector.shape_cast %38 : vector<1x1x4x8xf32> to vector<4x8xf32>
    %cst_55 = arith.constant dense<0.000000e+00> : vector<256x8xf32>
    %40 = tpu.matmul %37, %39, %cst_55 {dimension_numbers = #tpu.dot_dimension_numbers<[1], [0], [0], [1], [0, 0, 1, 1], [], []>} : vector<256x4xf32>, vector<4x8xf32>, vector<256x8xf32> -> vector<256x8xf32>
    %41 = arith.addf %35, %40 : vector<256x8xf32>
    %c2_56 = arith.constant 2 : index
    %c0_57 = arith.constant 0 : index
    %c0_58 = arith.constant 0 : index
    %42 = vector.load %arg5[%c2_56, %c0_57, %c0_58] : memref<18x18x4xf32, #tpu.memory_space<vmem>>, vector<16x16x4xf32>
    %43 = vector.shape_cast %42 : vector<16x16x4xf32> to vector<256x4xf32>
    %c2_59 = arith.constant 2 : index
    %c0_60 = arith.constant 0 : index
    %c0_61 = arith.constant 0 : index
    %c0_62 = arith.constant 0 : index
    %44 = vector.load %arg2[%c2_59, %c0_60, %c0_61, %c0_62] : memref<3x3x4x8xf32, #tpu.memory_space<vmem>>, vector<1x1x4x8xf32>
    %45 = vector.shape_cast %44 : vector<1x1x4x8xf32> to vector<4x8xf32>
    %cst_63 = arith.constant dense<0.000000e+00> : vector<256x8xf32>
    %46 = tpu.matmul %43, %45, %cst_63 {dimension_numbers = #tpu.dot_dimension_numbers<[1], [0], [0], [1], [0, 0, 1, 1], [], []>} : vector<256x4xf32>, vector<4x8xf32>, vector<256x8xf32> -> vector<256x8xf32>
    %47 = arith.addf %41, %46 : vector<256x8xf32>
    %c2_64 = arith.constant 2 : index
    %c1_65 = arith.constant 1 : index
    %c0_66 = arith.constant 0 : index
    %48 = vector.load %arg5[%c2_64, %c1_65, %c0_66] : memref<18x18x4xf32, #tpu.memory_space<vmem>>, vector<16x16x4xf32>
    %49 = vector.shape_cast %48 : vector<16x16x4xf32> to vector<256x4xf32>
    %c2_67 = arith.constant 2 : index
    %c1_68 = arith.constant 1 : index
    %c0_69 = arith.constant 0 : index
    %c0_70 = arith.constant 0 : index
    %50 = vector.load %arg2[%c2_67, %c1_68, %c0_69, %c0_70] : memref<3x3x4x8xf32, #tpu.memory_space<vmem>>, vector<1x1x4x8xf32>
    %51 = vector.shape_cast %50 : vector<1x1x4x8xf32> to vector<4x8xf32>
    %cst_71 = arith.constant dense<0.000000e+00> : vector<256x8xf32>
    %52 = tpu.matmul %49, %51, %cst_71 {dimension_numbers = #tpu.dot_dimension_numbers<[1], [0], [0], [1], [0, 0, 1, 1], [], []>} : vector<256x4xf32>, vector<4x8xf32>, vector<256x8xf32> -> vector<256x8xf32>
    %53 = arith.addf %47, %52 : vector<256x8xf32>
    %c2_72 = arith.constant 2 : index
    %c2_73 = arith.constant 2 : index
    %c0_74 = arith.constant 0 : index
    %54 = vector.load %arg5[%c2_72, %c2_73, %c0_74] : memref<18x18x4xf32, #tpu.memory_space<vmem>>, vector<16x16x4xf32>
    %55 = vector.shape_cast %54 : vector<16x16x4xf32> to vector<256x4xf32>
    %c2_75 = arith.constant 2 : index
    %c2_76 = arith.constant 2 : index
    %c0_77 = arith.constant 0 : index
    %c0_78 = arith.constant 0 : index
    %56 = vector.load %arg2[%c2_75, %c2_76, %c0_77, %c0_78] : memref<3x3x4x8xf32, #tpu.memory_space<vmem>>, vector<1x1x4x8xf32>
    %57 = vector.shape_cast %56 : vector<1x1x4x8xf32> to vector<4x8xf32>
    %cst_79 = arith.constant dense<0.000000e+00> : vector<256x8xf32>
    %58 = tpu.matmul %55, %57, %cst_79 {dimension_numbers = #tpu.dot_dimension_numbers<[1], [0], [0], [1], [0, 0, 1, 1], [], []>} : vector<256x4xf32>, vector<4x8xf32>, vector<256x8xf32> -> vector<256x8xf32>
    %59 = arith.addf %53, %58 : vector<256x8xf32>
    %c0_80 = arith.constant 0 : index
    %c0_81 = arith.constant 0 : index
    %60 = vector.load %arg3[%c0_80, %c0_81] : memref<1x8xf32, #tpu.memory_space<vmem>>, vector<1x8xf32>
    %61 = vector.broadcast %60 : vector<1x8xf32> to vector<256x8xf32>
    %62 = arith.addf %59, %61 : vector<256x8xf32>
    %cst_82 = arith.constant 0.000000e+00 : f32
    %63 = vector.broadcast %cst_82 : f32 to vector<256x8xf32>
    %64 = arith.cmpf oge, %62, %63 : vector<256x8xf32>
    %cst_83 = arith.constant 2.000000e-01 : f32
    %65 = vector.broadcast %cst_83 : f32 to vector<256x8xf32>
    %66 = arith.mulf %65, %62 : vector<256x8xf32>
    %67 = arith.select %64, %62, %66 : vector<256x8xi1>, vector<256x8xf32>
    %68 = vector.shape_cast %67 : vector<256x8xf32> to vector<16x16x8xf32>
    %c0_84 = arith.constant 0 : index
    %c0_85 = arith.constant 0 : index
    %c0_86 = arith.constant 0 : index
    %c0_87 = arith.constant 0 : index
    %69 = vector.load %arg4[%c0_84, %c0_85, %c0_86, %c0_87] : memref<1x16x16x8xf32, #tpu.memory_space<vmem>>, vector<1x16x16x8xf32>
    %70 = vector.shape_cast %69 : vector<1x16x16x8xf32> to vector<16x16x8xf32>
    %71 = vector.shape_cast %68 : vector<16x16x8xf32> to vector<1x16x16x8xf32>
    tpu.vector_store %arg4[%c0_84, %c0_85, %c0_86, %c0_87], %71 {strides = array<i32>} : memref<1x16x16x8xf32, #tpu.memory_space<vmem>>, vector<1x16x16x8xf32>,
    return
  }
  func.func @transform_0(%arg0: i32) -> (i32, i32, i32, i32) {
    %c0_i32 = arith.constant 0 : i32
    %c0_i32_0 = arith.constant 0 : i32
    %c0_i32_1 = arith.constant 0 : i32
    %c0_i32_2 = arith.constant 0 : i32
    return %arg0, %c0_i32, %c0_i32_0, %c0_i32_1 : i32, i32, i32, i32
  }
  func.func @transform_1(%arg0: i32) -> (i32, i32, i32, i32) {
    %c0_i32 = arith.constant 0 : i32
    %c0_i32_0 = arith.constant 0 : i32
    %c0_i32_1 = arith.constant 0 : i32
    %c0_i32_2 = arith.constant 0 : i32
    %c0_i32_3 = arith.constant 0 : i32
    return %c0_i32, %c0_i32_0, %c0_i32_1, %c0_i32_2 : i32, i32, i32, i32
  }
  func.func @transform_2(%arg0: i32) -> (i32, i32) {
    %c0_i32 = arith.constant 0 : i32
    %c0_i32_0 = arith.constant 0 : i32
    %c0_i32_1 = arith.constant 0 : i32
    return %c0_i32, %c0_i32_0 : i32, i32
  }
  func.func @transform_3(%arg0: i32) -> (i32, i32, i32, i32) {
    %c0_i32 = arith.constant 0 : i32
    %c0_i32_0 = arith.constant 0 : i32
    %c0_i32_1 = arith.constant 0 : i32
    %c0_i32_2 = arith.constant 0 : i32
    return %arg0, %c0_i32, %c0_i32_0, %c0_i32_1 : i32, i32, i32, i32
  }
}

</mosaic_0001>

<bundles_post_ra>
// kernel: tpu_custom_call.1
= control target key start
LH: loop header
LB: loop body
LE: loop exit
PB: predicated region body
PF: predicated region fallthrough
CT: control target
= control target key end

     0   :  { %s3311_s12 = smov 0   ;;  %s4485_s0 = inlined_call_operand.vmem [shape: f32[2,16,16,4], index: 0, kind: input, shape index: {}]   ;;  %s4486_s1 = inlined_call_operand.vmem [shape: f32[3,3,4,8], index: 1, kind: input, shape index: {}]   ;;  %s4487_s2 = inlined_call_operand.vmem [shape: f32[1,8], index: 2, kind: input, shape index: {}]   ;;  %s4488_s3 = inlined_call_operand.vmem [shape: f32[2,16,16,8], index: 3, kind: output, shape index: {}]  }
   0x1 LB: > { %s2951_s13 = sadd.s32 4294967295, %s3288_s12   ;;  %p2955_p0 = scmp.ge.s32.totalorder %s3288_s12, 1  ;;  %s3288_s12 = sphi %s3311_s12, %s13_s12  }
   0x2   : > { %p137_p1 = scmp.lt.s32.totalorder %s3288_s12, 3 }
   0x4   : > { %p138_p2 = pnand %p2955_p0, %p137_p1 }
   0x6   : > { %141 = sbr.rel (%p138_p2) target bundleno = 782 (0x30e), region = 32 }
   0xb   : > { %v2960_v0 = vld [vmem:[%s4486_s1 + $0x4] sm:$0xf]  ;;  %vm455_vm0 = vcmask 1043456   ;;  %p161_p3 = scmp.lt.s32.totalorder %s2951_s13, 1  ;;  %vm171_vm1 = vcmask 31744   ;;  %v3290_v1 = vmov 0.0  }
   0xc   : > { %3269 = vmatpush.msk.msra.mxu1 %vm455_vm0, %v2960_v0  ;;  %3270 = vmatpush.msk.msra.mxu2 %vm455_vm0, %v2960_v0  ;;  %185 = vst.msk [vmem:[#allocation2 + $0x60] sm:$0xff] %vm171_vm1, %v3290_v1  ;;  %v3027_v4 = vld [vmem:[%s4486_s1 + $0x8] sm:$0xf]  ;;  %v3061_v5 = vld [vmem:[%s4486_s1 + $0xc] sm:$0xf]  ;;  %vm174_vm2 = vcmask 25600  }
   0xd   : > { %s4593_s13 = smov (!%p161_p3, %s2951_s13), 1  ;;  %186 = vst.msk [vmem:[#allocation2 + $0x68] sm:$0xff] %vm171_vm1, %v3290_v1  ;;  %3271 = vmatpush.msk.msra.mxu3 %vm455_vm0, %v2960_v0  ;;  %2961 = vmatpush.msk.msra.mxu0 %vm455_vm0, %v2960_v0  ;;  %v324_v6 = vld [vmem:[%s4486_s1] sm:$0xf]  ;;  %v3095_v10 = vld [vmem:[%s4486_s1 + $0x10] sm:$0xf] }
   0xe   : > { %172 = vst.msk [vmem:[#allocation2] sm:$0xff] %vm171_vm1, %v3290_v1  ;;  %s3267_s16 = sshll.u32 %s4593_s13, 8  ;;  %3028 = vmatpush.msk.msrb.mxu2 %vm455_vm0, %v3027_v4  ;;  %2994 = vmatpush.msk.msrb.mxu1 %vm455_vm0, %v324_v6  ;;  %v3163_v57 = vld [vmem:[%s4486_s1 + $0x18] sm:$0xf]  ;;  %v3197_v58 = vld [vmem:[%s4486_s1 + $0x1c] sm:$0xf] }
   0xf   : > { %173 = vst.msk [vmem:[#allocation2 + $0x8] sm:$0xff] %vm171_vm1, %v3290_v1  ;;  %s3342_s19 = scalar_lea.vmem %s4485_s0, %s3267_s16  ;;  %3062 = vmatpush.msk.msrb.mxu3 %vm455_vm0, %v3061_v5  ;;  %3096 = vmatpush.msk.msrb.mxu0 %vm455_vm0, %v3095_v10  ;;  %v3129_v59 = vld [vmem:[%s4486_s1 + $0x14] sm:$0xf]  ;;  %v3231_v0 = vld [vmem:[%s4486_s1 + $0x20] sm:$0xf]  ;;  %s4288_s15 = scalar_lea.vmem %s4488_s3, %s3267_s16  ;;  %vm2863_vm4 = vcmask 64512  }
  0x10   : > { %176 = vst.msk [vmem:[#allocation2 + $0x18] sm:$0xff] %vm171_vm1, %v3290_v1  ;;  %v233_v2 = vld [vmem:[%s3342_s19 + $0x30] sm:$0xff]  ;;  %v234_v11 = vld [vmem:[%s3342_s19 + $0x38] sm:$0xff]  ;;  %v235_v18 = vld [vmem:[%s3342_s19 + $0x40] sm:$0xff] }
  0x11   : > { %177 = vst.msk [vmem:[#allocation2 + $0x20] sm:$0xff] %vm171_vm1, %v3290_v1  ;;  %v241_v7 = vld [vmem:[%s3342_s19 + $0x70] sm:$0xff]  ;;  %v242_v16 = vld [vmem:[%s3342_s19 + $0x78] sm:$0xff]  ;;  %v243_v19 = vld [vmem:[%s3342_s19 + $0x80] sm:$0xff] }
  0x12   : > { %266 = vst.msk [vmem:[#allocation2 + $0x61] sm:$0xff] %vm171_vm1, %v233_v2  ;;  %v249_v9 = vld [vmem:[%s3342_s19 + $0xb0] sm:$0xff]  ;;  %v250_v17 = vld [vmem:[%s3342_s19 + $0xb8] sm:$0xff]  ;;  %v251_v20 = vld [vmem:[%s3342_s19 + $0xc0] sm:$0xff] }
  0x13   : > { %179 = vst.msk [vmem:[#allocation2 + $0x30] sm:$0xff] %vm171_vm1, %v3290_v1  ;;  %v236_v21 = vld [vmem:[%s3342_s19 + $0x48] sm:$0xff]  ;;  %v227_v23 = vld [vmem:[%s3342_s19] sm:$0xff]  ;;  %v237_v25 = vld [vmem:[%s3342_s19 + $0x50] sm:$0xff] }
  0x14   : > { %180 = vst.msk [vmem:[#allocation2 + $0x38] sm:$0xff] %vm171_vm1, %v3290_v1  ;;  %v244_v22 = vld [vmem:[%s3342_s19 + $0x88] sm:$0xff]  ;;  %v245_v27 = vld [vmem:[%s3342_s19 + $0x90] sm:$0xff]  ;;  %v238_v32 = vld [vmem:[%s3342_s19 + $0x58] sm:$0xff] }
  0x15   : > { %182 = vst.msk [vmem:[#allocation2 + $0x48] sm:$0xff] %vm171_vm1, %v3290_v1  ;;  %v252_v24 = vld [vmem:[%s3342_s19 + $0xc8] sm:$0xff]  ;;  %v253_v31 = vld [vmem:[%s3342_s19 + $0xd0] sm:$0xff]  ;;  %v246_v33 = vld [vmem:[%s3342_s19 + $0x98] sm:$0xff] }
  0x16   : > { %183 = vst.msk [vmem:[#allocation2 + $0x50] sm:$0xff] %vm171_vm1, %v3290_v1  ;;  %v325_v8 = vld [vmem:[#allocation2 + $0x1] sm:$0xff]  ;;  %v229_v34 = vld [vmem:[%s3342_s19 + $0x10] sm:$0xff]  ;;  %v254_v36 = vld [vmem:[%s3342_s19 + $0xd8] sm:$0xff] }
  0x17   : > { %188 = vst.msk [vmem:[#allocation2 + $0x78] sm:$0xff] %vm171_vm1, %v3290_v1  ;;  %2962 = vmatmul.msk.f32.vlgmr.msra.gmra.mxu0 %vm171_vm1, %v325_v8  ;;  %v228_v29 = vld [vmem:[%s3342_s19 + $0x8] sm:$0xff]  ;;  %v239_v39 = vld [vmem:[%s3342_s19 + $0x60] sm:$0xff]  ;;  %v230_v42 = vld [vmem:[%s3342_s19 + $0x18] sm:$0xff] }
  0x18   : > { %189 = vst.msk [vmem:[#allocation2 + $0x80] sm:$0xff] %vm171_vm1, %v3290_v1  ;;  %v247_v41 = vld [vmem:[%s3342_s19 + $0xa0] sm:$0xff]  ;;  %v240_v44 = vld [vmem:[%s3342_s19 + $0x68] sm:$0xff]  ;;  %3232 = vmatpush.msk.msra.mxu0 %vm455_vm0, %v3231_v0 }
  0x19   : > { %v3362_v3 = vld [vmem:[#allocation2 + $0x61] sm:$0xff]  ;;  %191 = vst.msk [vmem:[#allocation2 + $0x90] sm:$0xff] %vm171_vm1, %v3290_v1 }
  0x1a   : > { %2970 = vmatmul.msk.f32.vlgmr.msra.gmra.mxu1 %vm171_vm1, %v3362_v3  ;;  %192 = vst.msk [vmem:[#allocation2 + $0x98] sm:$0xff] %vm171_vm1, %v3290_v1  ;;  %v255_v43 = vld [vmem:[%s3342_s19 + $0xe0] sm:$0xff]  ;;  %v248_v45 = vld [vmem:[%s3342_s19 + $0xa8] sm:$0xff] }
  0x1b   : > { %194 = vst.msk [vmem:[#allocation2 + $0xa8] sm:$0xff] %vm171_vm1, %v3290_v1  ;;  %v231_v47 = vld [vmem:[%s3342_s19 + $0x20] sm:$0xff]  ;;  %v256_v49 = vld [vmem:[%s3342_s19 + $0xe8] sm:$0xff]  ;;  %3130 = vmatpush.msk.msra.mxu1 %vm455_vm0, %v3129_v59 }
  0x1c   : > { %195 = vst.msk [vmem:[#allocation2 + $0xb0] sm:$0xff] %vm171_vm1, %v3290_v1  ;;  %v232_v52 = vld [vmem:[%s3342_s19 + $0x28] sm:$0xff] }
  0x1d   : > { %197 = vst.msk [vmem:[#allocation2 + $0xc0] sm:$0xff] %vm171_vm1, %v3290_v1  ;;  %v784_v10 = vld [vmem:[#allocation2 + $0x2] sm:$0xff] }
  0x1e   : > { %198 = vst.msk [vmem:[#allocation2 + $0xc8] sm:$0xff] %vm171_vm1, %v3290_v1 }
  0x1f   : > { %200 = vst.msk [vmem:[#allocation2 + $0xd8] sm:$0xff] %vm171_vm1, %v3290_v1 }
  0x20   : > { %201 = vst.msk [vmem:[#allocation2 + $0xe0] sm:$0xff] %vm171_vm1, %v3290_v1 }
  0x21   : > { %203 = vst.msk [vmem:[#allocation2 + $0xf0] sm:$0xff] %vm171_vm1, %v3290_v1 }
  0x22   : > { %204 = vst.msk [vmem:[#allocation2 + $0xf8] sm:$0xff] %vm171_vm1, %v3290_v1 }
  0x23   : > { %206 = vst.msk [vmem:[#allocation2 + $0x108] sm:$0xff] %vm171_vm1, %v3290_v1 }
  0x24   : > { %207 = vst.msk [vmem:[#allocation2 + $0x110] sm:$0xff] %vm171_vm1, %v3290_v1 }
  0x25   : > { %209 = vst.msk [vmem:[#allocation2 + $0x120] sm:$0xff] %vm171_vm1, %v3290_v1 }
  0x26   : > { %210 = vst.msk [vmem:[#allocation2 + $0x128] sm:$0xff] %vm171_vm1, %v3290_v1 }
  0x27   : > { %212 = vst.msk [vmem:[#allocation2 + $0x138] sm:$0xff] %vm171_vm1, %v3290_v1 }
  0x28   : > { %213 = vst.msk [vmem:[#allocation2 + $0x140] sm:$0xff] %vm171_vm1, %v3290_v1 }
  0x29   : > { %215 = vst.msk [vmem:[#allocation2 + $0x150] sm:$0xff] %vm171_vm1, %v3290_v1 }
  0x2a   : > { %216 = vst.msk [vmem:[#allocation2 + $0x158] sm:$0xff] %vm171_vm1, %v3290_v1 }
  0x2b   : > { %218 = vst.msk [vmem:[#allocation2 + $0x168] sm:$0xff] %vm171_vm1, %v3290_v1 }
  0x2c   : > { %219 = vst.msk [vmem:[#allocation2 + $0x170] sm:$0xff] %vm171_vm1, %v3290_v1 }
  0x2d   : > { %221 = vst.msk [vmem:[#allocation2 + $0x180] sm:$0xff] %vm171_vm1, %v3290_v1 }
  0x2e   : > { %222 = vst.msk [vmem:[#allocation2 + $0x188] sm:$0xff] %vm171_vm1, %v3290_v1 }
  0x2f   : > { %224 = vst.msk [vmem:[#allocation2 + $0x198] sm:$0xff] %vm171_vm1, %v3290_v1 }
  0x30   : > { %225 = vst.msk [vmem:[#allocation2 + $0x1a0] sm:$0xff] %vm171_vm1, %v3290_v1 }
  0x31   : > { %274 = vst.msk [vmem:[#allocation2 + $0xc1] sm:$0xff] %vm171_vm1, %v241_v7 }
  0x32   : > { %282 = vst.msk [vmem:[#allocation2 + $0x121] sm:$0xff] %vm171_vm1, %v249_v9  ;;  %v292_v9 = vld [vmem:[#allocation2] sm:$0xff] }
  0x33   : > { %187 = vst.msk [vmem:[#allocation2 + $0x70] sm:$0x3] %vm174_vm2, %v3290_v1 }
  0x34   : > { %267 = vst.msk [vmem:[#allocation2 + $0x69] sm:$0xff] %vm171_vm1, %v234_v11 }
  0x35   : > { %175 = vst.msk [vmem:[#allocation2 + $0x10] sm:$0x3] %vm174_vm2, %v3290_v1 }
  0x36   : > { %178 = vst.msk [vmem:[#allocation2 + $0x28] sm:$0x3] %vm174_vm2, %v3290_v1 }
  0x37   : > { %181 = vst.msk [vmem:[#allocation2 + $0x40] sm:$0x3] %vm174_vm2, %v3290_v1 }
  0x38   : > { %v3445_v12 = vld [vmem:[#allocation2 + $0xc1] sm:$0xff]  ;;  %184 = vst.msk [vmem:[#allocation2 + $0x58] sm:$0x3] %vm174_vm2, %v3290_v1 }
  0x39   : > { %2978 = vmatmul.msk.f32.vlgmr.msra.gmra.mxu2 %vm171_vm1, %v3445_v12  ;;  %v3451_v13 = vld [vmem:[#allocation2 + $0x121] sm:$0xff]  ;;  %190 = vst.msk [vmem:[#allocation2 + $0x88] sm:$0x3] %vm174_vm2, %v3290_v1 }
  0x3a   : > { %2986 = vmatmul.msk.f32.vlgmr.msra.gmra.mxu3 %vm171_vm1, %v3451_v13  ;;  %193 = vst.msk [vmem:[#allocation2 + $0xa0] sm:$0x3] %vm174_vm2, %v3290_v1  ;;  %3164 = vmatpush.msk.msra.mxu2 %vm455_vm0, %v3163_v57 }
  0x3b   : > { %v3459_v14 = vld [vmem:[#allocation2 + $0x69] sm:$0xff]  ;;  %196 = vst.msk [vmem:[#allocation2 + $0xb8] sm:$0x3] %vm174_vm2, %v3290_v1  ;;  %3198 = vmatpush.msk.msra.mxu3 %vm455_vm0, %v3197_v58 }
  0x3c   : > { %2971 = vmatmul.msk.f32.gmra.mxu1 %vm171_vm1, %v3459_v14  ;;  %199 = vst.msk [vmem:[#allocation2 + $0xd0] sm:$0x3] %vm174_vm2, %v3290_v1  ;;  %v326_v15 = vld [vmem:[#allocation2 + $0x9] sm:$0xff] }
  0x3d   : > { %202 = vst.msk [vmem:[#allocation2 + $0xe8] sm:$0x3] %vm174_vm2, %v3290_v1  ;;  %2963 = vmatmul.msk.f32.gmra.mxu0 %vm171_vm1, %v326_v15  ;;  %v293_v15 = vld [vmem:[#allocation2 + $0x8] sm:$0xff] }
  0x3e   : > { %205 = vst.msk [vmem:[#allocation2 + $0x100] sm:$0x3] %vm174_vm2, %v3290_v1 }
  0x3f   : > { %208 = vst.msk [vmem:[#allocation2 + $0x118] sm:$0x3] %vm174_vm2, %v3290_v1 }
  0x40   : > { %211 = vst.msk [vmem:[#allocation2 + $0x130] sm:$0x3] %vm174_vm2, %v3290_v1 }
  0x41   : > { %214 = vst.msk [vmem:[#allocation2 + $0x148] sm:$0x3] %vm174_vm2, %v3290_v1 }
  0x42   : > { %217 = vst.msk [vmem:[#allocation2 + $0x160] sm:$0x3] %vm174_vm2, %v3290_v1 }
  0x43   : > { %220 = vst.msk [vmem:[#allocation2 + $0x178] sm:$0x3] %vm174_vm2, %v3290_v1 }
  0x44   : > { %223 = vst.msk [vmem:[#allocation2 + $0x190] sm:$0x3] %vm174_vm2, %v3290_v1 }
  0x45   : > { %226 = vst.msk [vmem:[#allocation2 + $0x1a8] sm:$0x3] %vm174_vm2, %v3290_v1 }
  0x46   : > { %275 = vst.msk [vmem:[#allocation2 + $0xc9] sm:$0xff] %vm171_vm1, %v242_v16  ;;  %v785_v16 = vld [vmem:[#allocation2 + $0xa] sm:$0xff] }
  0x47   : > { %283 = vst.msk [vmem:[#allocation2 + $0x129] sm:$0xff] %vm171_vm1, %v250_v17 }
  0x48   : > { %268 = vst.msk [vmem:[#allocation2 + $0x79] sm:$0xff] %vm171_vm1, %v235_v18 }
  0x49   : > { %276 = vst.msk [vmem:[#allocation2 + $0xd9] sm:$0xff] %vm171_vm1, %v243_v19 }
  0x4a   : > { %284 = vst.msk [vmem:[#allocation2 + $0x139] sm:$0xff] %vm171_vm1, %v251_v20 }
  0x4b   : > { %269 = vst.msk [vmem:[#allocation2 + $0x81] sm:$0xff] %vm171_vm1, %v236_v21 }
  0x4c   : > { %277 = vst.msk [vmem:[#allocation2 + $0xe1] sm:$0xff] %vm171_vm1, %v244_v22 }
  0x4d   : > { %v3503_v26 = vld [vmem:[#allocation2 + $0xc9] sm:$0xff]  ;;  %260 = vst.msk [vmem:[#allocation2 + $0x19] sm:$0xff] %vm171_vm1, %v227_v23 }
  0x4e   : > { %2979 = vmatmul.msk.f32.gmra.mxu2 %vm171_vm1, %v3503_v26  ;;  %v3509_v28 = vld [vmem:[#allocation2 + $0x129] sm:$0xff]  ;;  %285 = vst.msk [vmem:[#allocation2 + $0x141] sm:$0xff] %vm171_vm1, %v252_v24 }
  0x4f   : > { %2987 = vmatmul.msk.f32.gmra.mxu3 %vm171_vm1, %v3509_v28  ;;  %v3515_v30 = vld [vmem:[#allocation2 + $0x79] sm:$0xff]  ;;  %270 = vst.msk [vmem:[#allocation2 + $0x91] sm:$0xff] %vm171_vm1, %v237_v25 }
  0x50   : > { %2972 = vmatmul.msk.f32.gmra.mxu1 %vm171_vm1, %v3515_v30  ;;  %278 = vst.msk [vmem:[#allocation2 + $0xf1] sm:$0xff] %vm171_vm1, %v245_v27  ;;  %v3527_v35 = vld [vmem:[#allocation2 + $0xd9] sm:$0xff] }
  0x51   : > { %261 = vst.msk [vmem:[#allocation2 + $0x21] sm:$0xff] %vm171_vm1, %v228_v29  ;;  %v3531_v37 = vld [vmem:[#allocation2 + $0x139] sm:$0xff] }
  0x52   : > { %286 = vst.msk [vmem:[#allocation2 + $0x151] sm:$0xff] %vm171_vm1, %v253_v31  ;;  %v3537_v40 = vld [vmem:[#allocation2 + $0x81] sm:$0xff] }
  0x53   : > { %271 = vst.msk [vmem:[#allocation2 + $0x99] sm:$0xff] %vm171_vm1, %v238_v32  ;;  %v3561_v48 = vld [vmem:[#allocation2 + $0xe1] sm:$0xff] }
  0x54   : > { %v3533_v38 = vld [vmem:[#allocation2 + $0x19] sm:$0xff]  ;;  %279 = vst.msk [vmem:[#allocation2 + $0xf9] sm:$0xff] %vm171_vm1, %v246_v33  ;;  %v3732_v33 = vld [vmem:[#allocation2 + $0x68] sm:$0xff] }
  0x55   : > { %2964 = vmatmul.msk.f32.gmra.mxu0 %vm171_vm1, %v3533_v38  ;;  %262 = vst.msk [vmem:[#allocation2 + $0x31] sm:$0xff] %vm171_vm1, %v229_v34  ;;  %v3565_v50 = vld [vmem:[#allocation2 + $0x141] sm:$0xff]  ;;  %v1062_v11 = vld [vmem:[#allocation2 + $0x18] sm:$0xff] }
  0x56   : > { %2980 = vmatmul.msk.f32.gmra.mxu2 %vm171_vm1, %v3527_v35  ;;  %287 = vst.msk [vmem:[#allocation2 + $0x159] sm:$0xff] %vm171_vm1, %v254_v36  ;;  %v3568_v51 = vld [vmem:[#allocation2 + $0x91] sm:$0xff]  ;;  %v3718_v29 = vld [vmem:[#allocation2 + $0x60] sm:$0xff] }
  0x57   : > { %2988 = vmatmul.msk.f32.gmra.mxu3 %vm171_vm1, %v3531_v37  ;;  %272 = vst.msk [vmem:[#allocation2 + $0xa9] sm:$0xff] %vm171_vm1, %v239_v39  ;;  %v3584_v54 = vld [vmem:[#allocation2 + $0xf1] sm:$0xff]  ;;  %v3744_v34 = vld [vmem:[#allocation2 + $0x62] sm:$0xff] }
  0x58   : > { %2973 = vmatmul.msk.f32.gmra.mxu1 %vm171_vm1, %v3537_v40  ;;  %280 = vst.msk [vmem:[#allocation2 + $0x109] sm:$0xff] %vm171_vm1, %v247_v41  ;;  %v3557_v46 = vld [vmem:[#allocation2 + $0x21] sm:$0xff] }
  0x59   : > { %263 = vst.msk [vmem:[#allocation2 + $0x39] sm:$0xff] %vm171_vm1, %v230_v42  ;;  %v3586_v55 = vld [vmem:[#allocation2 + $0x151] sm:$0xff]  ;;  %v1063_v17 = vld [vmem:[#allocation2 + $0x20] sm:$0xff] }
  0x5a   : > { %288 = vst.msk [vmem:[#allocation2 + $0x169] sm:$0xff] %vm171_vm1, %v255_v43  ;;  %v3588_v56 = vld [vmem:[#allocation2 + $0x99] sm:$0xff]  ;;  %v3680_v20 = vld [vmem:[#allocation2 + $0x22] sm:$0xff]  ;;  %v3764_v42 = vld [vmem:[#allocation2 + $0x6a] sm:$0xff] }
  0x5b   : > { %273 = vst.msk [vmem:[#allocation2 + $0xb1] sm:$0xff] %vm171_vm1, %v240_v44  ;;  %v3612_v61 = vld [vmem:[#allocation2 + $0xf9] sm:$0xff]  ;;  %v3804_v59 = vld [vmem:[#allocation2 + $0x82] sm:$0xff] }
  0x5c   : > { %281 = vst.msk [vmem:[#allocation2 + $0x111] sm:$0xff] %vm171_vm1, %v248_v45  ;;  %v3582_v53 = vld [vmem:[#allocation2 + $0x31] sm:$0xff]  ;;  %v3669_v18 = vld [vmem:[#allocation2 + $0x1a] sm:$0xff] }
  0x5d   : > { %2965 = vmatmul.msk.f32.gmra.mxu0 %vm171_vm1, %v3557_v46  ;;  %264 = vst.msk [vmem:[#allocation2 + $0x49] sm:$0xff] %vm171_vm1, %v231_v47  ;;  %v3614_v62 = vld [vmem:[#allocation2 + $0x159] sm:$0xff]  ;;  %v3671_v19 = vld [vmem:[#allocation2 + $0x30] sm:$0xff] }
  0x5e   : > { %2981 = vmatmul.msk.f32.gmra.mxu2 %vm171_vm1, %v3561_v48  ;;  %289 = vst.msk [vmem:[#allocation2 + $0x171] sm:$0xff] %vm171_vm1, %v256_v49  ;;  %v3616_v63 = vld [vmem:[#allocation2 + $0xa9] sm:$0xff]  ;;  %v3766_v43 = vld [vmem:[#allocation2 + $0x80] sm:$0xff]  ;;  %v3806_v0 = vld [vmem:[#allocation2 + $0x98] sm:$0xff] }
  0x5f   : > { %2989 = vmatmul.msk.f32.gmra.mxu3 %vm171_vm1, %v3565_v50  ;;  %265 = vst.msk [vmem:[#allocation2 + $0x51] sm:$0xff] %vm171_vm1, %v232_v52  ;;  %v3632_v2 = vld [vmem:[#allocation2 + $0x109] sm:$0xff]  ;;  %v3784_v47 = vld [vmem:[#allocation2 + $0x7a] sm:$0xff] }
  0x60   : > { %2974 = vmatmul.msk.f32.gmra.mxu1 %vm171_vm1, %v3568_v51  ;;  %v3610_v60 = vld [vmem:[#allocation2 + $0x39] sm:$0xff]  ;;  %4514 = vst [vmem:[#allocation3_spill] sm:$0xff] %v3732_v33  ;;  %v3786_v49 = vld [vmem:[#allocation2 + $0x90] sm:$0xff] }
  0x61   : > { %v3634_v4 = vld [vmem:[#allocation2 + $0x169] sm:$0xff]  ;;  %v3682_v21 = vld [vmem:[#allocation2 + $0x38] sm:$0xff]  ;;  %4517 = vst [vmem:[#allocation6_spill] sm:$0xff] %v3764_v42 }
  0x62   : > { %v3636_v5 = vld [vmem:[#allocation2 + $0xb1] sm:$0xff]  ;;  %v3704_v24 = vld [vmem:[#allocation2 + $0x3a] sm:$0xff]  ;;  %4518 = vst [vmem:[#allocation7_spill] sm:$0xff] %v3766_v43 }
  0x63   : > { %v3648_v7 = vld [vmem:[#allocation2 + $0x111] sm:$0xff]  ;;  %4520 = vst [vmem:[#allocation9_spill] sm:$0xff] %v3784_v47 }
  0x64   : > { %v3630_v1 = vld [vmem:[#allocation2 + $0x49] sm:$0xff]  ;;  %v3692_v22 = vld [vmem:[#allocation2 + $0x32] sm:$0xff]  ;;  %4521 = vst [vmem:[#allocation10_spill] sm:$0xff] %v3786_v49 }
  0x65   : > { %2966 = vmatmul.msk.f32.gmra.mxu0 %vm171_vm1, %v3582_v53  ;;  %v3650_v8 = vld [vmem:[#allocation2 + $0x171] sm:$0xff]  ;;  %v3694_v23 = vld [vmem:[#allocation2 + $0x48] sm:$0xff]  ;;  %4523 = vst [vmem:[#allocation12_spill] sm:$0xff] %v3804_v59 }
  0x66   : > { %2982 = vmatmul.msk.f32.gmra.mxu2 %vm171_vm1, %v3584_v54  ;;  %v3646_v6 = vld [vmem:[#allocation2 + $0x51] sm:$0xff]  ;;  %4524 = vst [vmem:[#allocation13_spill] sm:$0xff] %v3806_v0 }
  0x67   : > { %2990 = vmatmul.msk.f32.gmra.mxu3 %vm171_vm1, %v3586_v55  ;;  %v3706_v25 = vld [vmem:[#allocation2 + $0x50] sm:$0xff] }
  0x68   : > { %2975 = vmatmul.msk.f32.gmra.mxu1 %vm171_vm1, %v3588_v56  ;;  %v3716_v27 = vld [vmem:[#allocation2 + $0x4a] sm:$0xff]  ;;  %v3730_v32 = vld [vmem:[#allocation2 + $0x52] sm:$0xff] }
  0x6d   : > { %2967 = vmatmul.msk.f32.gmra.mxu0 %vm171_vm1, %v3610_v60 }
  0x6e   : > { %2983 = vmatmul.msk.f32.gmra.mxu2 %vm171_vm1, %v3612_v61 }
  0x6f   : > { %2991 = vmatmul.msk.f32.gmra.mxu3 %vm171_vm1, %v3614_v62 }
  0x70   : > { %2976 = vmatmul.msk.f32.gmra.mxu1 %vm171_vm1, %v3616_v63 }
  0x75   : > { %2968 = vmatmul.msk.f32.gmra.mxu0 %vm171_vm1, %v3630_v1 }
  0x76   : > { %2984 = vmatmul.msk.f32.gmra.mxu2 %vm171_vm1, %v3632_v2 }
  0x77   : > { %2992 = vmatmul.msk.f32.gmra.mxu3 %vm171_vm1, %v3634_v4 }
  0x78   : > { %2977 = vmatmul.msk.f32.gmra.mxu1 %vm171_vm1, %v3636_v5 }
  0x7d   : > { %2969 = vmatmul.msk.f32.gmra.mxu0 %vm171_vm1, %v3646_v6 }
  0x7e   : > { %2985 = vmatmul.msk.f32.gmra.mxu2 %vm171_vm1, %v3648_v7 }
  0x7f   : > { %2993 = vmatmul.msk.f32.gmra.mxu3 %vm171_vm1, %v3650_v8 }
  0x80   : > { %2995 = vmatmul.msk.f32.vlgmr.msrb.gmra.mxu1 %vm171_vm1, %v292_v9 }
  0x85   : > { %3097 = vmatmul.msk.f32.vlgmr.msrb.gmra.mxu0 %vm171_vm1, %v3533_v38  ;;  %v3748_v38 = vld [vmem:[#allocation2 + $0x78] sm:$0xff] }
  0x86   : > { %3029 = vmatmul.msk.f32.vlgmr.msrb.gmra.mxu2 %vm171_vm1, %v784_v10  ;;  %4515 = vst [vmem:[#allocation4_spill] sm:$0xff] %v3748_v38 }
  0x87   : > { %3063 = vmatmul.msk.f32.vlgmr.msrb.gmra.mxu3 %vm171_vm1, %v1062_v11 }
  0x88   : > { %2996 = vmatmul.msk.f32.gmra.mxu1 %vm171_vm1, %v293_v15  ;;  %v3824_v15 = vld [vmem:[#allocation2 + $0x92] sm:$0xff] }
  0x89   : > { %4526 = vst [vmem:[#allocation15_spill] sm:$0xff] %v3824_v15 }
  0x8d   : > { %3098 = vmatmul.msk.f32.gmra.mxu0 %vm171_vm1, %v3557_v46 }
  0x8e   : > { %3030 = vmatmul.msk.f32.gmra.mxu2 %vm171_vm1, %v785_v16  ;;  %v3826_v16 = vld [vmem:[#allocation2 + $0xa8] sm:$0xff] }
  0x8f   : > { %3064 = vmatmul.msk.f32.gmra.mxu3 %vm171_vm1, %v1063_v17  ;;  %4527 = vst [vmem:[#allocation16_spill] sm:$0xff] %v3826_v16 }
  0x90   : > { %2997 = vmatmul.msk.f32.gmra.mxu1 %vm171_vm1, %v1062_v11 }
  0x95   : > { %3099 = vmatmul.msk.f32.gmra.mxu0 %vm171_vm1, %v3582_v53 }
  0x96   : > { %3031 = vmatmul.msk.f32.gmra.mxu2 %vm171_vm1, %v3669_v18 }
  0x97   : > { %3065 = vmatmul.msk.f32.gmra.mxu3 %vm171_vm1, %v3671_v19  ;;  %v3728_v31 = vpop.f32.mrf.mxu1 }
  0x98   : > { %2998 = vmatmul.msk.f32.gmra.mxu1 %vm171_vm1, %v1063_v17 }
  0x9d   : > { %3100 = vmatmul.msk.f32.gmra.mxu0 %vm171_vm1, %v3610_v60 }
  0x9e   : > { %3032 = vmatmul.msk.f32.gmra.mxu2 %vm171_vm1, %v3680_v20 }
  0x9f   : > { %3066 = vmatmul.msk.f32.gmra.mxu3 %vm171_vm1, %v3682_v21 }
  0xa0   : > { %2999 = vmatmul.msk.f32.gmra.mxu1 %vm171_vm1, %v3671_v19 }
  0xa5   : > { %3101 = vmatmul.msk.f32.gmra.mxu0 %vm171_vm1, %v3630_v1 }
  0xa6   : > { %3033 = vmatmul.msk.f32.gmra.mxu2 %vm171_vm1, %v3692_v22 }
  0xa7   : > { %3067 = vmatmul.msk.f32.gmra.mxu3 %vm171_vm1, %v3694_v23 }
  0xa8   : > { %3000 = vmatmul.msk.f32.gmra.mxu1 %vm171_vm1, %v3682_v21 }
  0xad   : > { %3102 = vmatmul.msk.f32.gmra.mxu0 %vm171_vm1, %v3646_v6 }
  0xae   : > { %3034 = vmatmul.msk.f32.gmra.mxu2 %vm171_vm1, %v3704_v24 }
  0xaf   : > { %3068 = vmatmul.msk.f32.gmra.mxu3 %vm171_vm1, %v3706_v25 }
  0xb0   : > { %3001 = vmatmul.msk.f32.gmra.mxu1 %vm171_vm1, %v3694_v23 }
  0xb5   : > { %3103 = vmatmul.msk.f32.gmra.mxu0 %vm171_vm1, %v3362_v3  ;;  %v3738_v3 = vpop.f32.mrf.mxu0 }
  0xb6   : > { %3035 = vmatmul.msk.f32.gmra.mxu2 %vm171_vm1, %v3716_v27 }
  0xb7   : > { %3069 = vmatmul.msk.f32.gmra.mxu3 %vm171_vm1, %v3718_v29 }
  0xb8   : > { %3002 = vmatmul.msk.f32.gmra.mxu1 %vm171_vm1, %v3706_v25 }
  0xb9   : > { %v3746_v36 = vpop.f32.mrf.mxu1 }
  0xbd   : > { %3104 = vmatmul.msk.f32.gmra.mxu0 %vm171_vm1, %v3459_v14  ;;  %v3756_v14 = vpop.f32.mrf.mxu2  ;;  %v3758_v39 = vpop.f32.mrf.mxu3 }
  0xbe   : > { %3036 = vmatmul.msk.f32.gmra.mxu2 %vm171_vm1, %v3730_v32  ;;  %4516 = vst [vmem:[#allocation5_spill] sm:$0xff] %v3758_v39  ;;  %v3762_v41 = vpop.f32.mrf.mxu0  ;;  %v3846_v39 = vld [vmem:[#allocation2 + $0xb0] sm:$0xff] }
  0xbf   : > { %3070 = vmatmul.msk.f32.gmra.mxu3 %vm171_vm1, %v3732_v33  ;;  %4531 = vst [vmem:[#allocation20_spill] sm:$0xff] %v3846_v39 }
  0xc0   : > { %3003 = vmatmul.msk.f32.gmra.mxu1 %vm171_vm1, %v3718_v29 }
  0xc5   : > { %3105 = vmatmul.msk.f32.gmra.mxu0 %vm171_vm1, %v3515_v30 }
  0xc6   : > { %3037 = vmatmul.msk.f32.gmra.mxu2 %vm171_vm1, %v3744_v34 }
  0xc7   : > { %3071 = vmatmul.msk.f32.gmra.mxu3 %vm171_vm1, %v3748_v38 }
  0xc8   : > { %3004 = vmatmul.msk.f32.gmra.mxu1 %vm171_vm1, %v3732_v33  ;;  %v3913_v33 = vld [vmem:[#allocation2 + $0xca] sm:$0xff] }
  0xcd   : > { %v3768_v30 = vpop.f32.mrf.mxu1  ;;  %3106 = vmatmul.msk.f32.gmra.mxu0 %vm171_vm1, %v3537_v40 }
  0xce   : > { %3038 = vmatmul.msk.f32.gmra.mxu2 %vm171_vm1, %v3764_v42 }
  0xcf   : > { %3072 = vmatmul.msk.f32.gmra.mxu3 %vm171_vm1, %v3766_v43 }
  0xd0   : > { %3005 = vmatmul.msk.f32.gmra.mxu1 %vm171_vm1, %v3748_v38  ;;  %v3886_v38 = vld [vmem:[#allocation2 + $0xc8] sm:$0xff] }
  0xd1   : > { %v3778_v44 = vpop.f32.mrf.mxu2 }
  0xd2   : > { %v3780_v45 = vpop.f32.mrf.mxu3  ;;  %v3782_v46 = vpop.f32.mrf.mxu0 }
  0xd3   : > { %4519 = vst [vmem:[#allocation8_spill] sm:$0xff] %v3780_v45  ;;  %v3844_v45 = vld [vmem:[#allocation2 + $0x9a] sm:$0xff] }
  0xd4   : > { %4530 = vst [vmem:[#allocation19_spill] sm:$0xff] %v3844_v45 }
  0xd5   : > { %v3788_v40 = vpop.f32.mrf.mxu1  ;;  %3107 = vmatmul.msk.f32.gmra.mxu0 %vm171_vm1, %v3568_v51 }
  0xd6   : > { %3039 = vmatmul.msk.f32.gmra.mxu2 %vm171_vm1, %v3784_v47  ;;  %v3902_v47 = vld [vmem:[#allocation2 + $0xd8] sm:$0xff] }
  0xd7   : > { %3073 = vmatmul.msk.f32.gmra.mxu3 %vm171_vm1, %v3786_v49 }
  0xd8   : > { %3006 = vmatmul.msk.f32.gmra.mxu1 %vm171_vm1, %v3766_v43  ;;  %v3866_v43 = vld [vmem:[#allocation2 + $0xc0] sm:$0xff] }
  0xd9   : > { %v3798_v52 = vpop.f32.mrf.mxu2  ;;  %4535 = vst [vmem:[#allocation24_spill] sm:$0xff] %v3866_v43 }
  0xda   : > { %v3800_v57 = vpop.f32.mrf.mxu3  ;;  %v3802_v58 = vpop.f32.mrf.mxu0 }
  0xdb   : > { %4522 = vst [vmem:[#allocation11_spill] sm:$0xff] %v3800_v57 }
  0xdd   : > { %v3808_v51 = vpop.f32.mrf.mxu1  ;;  %3108 = vmatmul.msk.f32.gmra.mxu0 %vm171_vm1, %v3588_v56 }
  0xde   : > { %3040 = vmatmul.msk.f32.gmra.mxu2 %vm171_vm1, %v3804_v59  ;;  %v3884_v59 = vld [vmem:[#allocation2 + $0xb2] sm:$0xff] }
  0xdf   : > { %3074 = vmatmul.msk.f32.gmra.mxu3 %vm171_vm1, %v3806_v0  ;;  %4538 = vst [vmem:[#allocation27_spill] sm:$0xff] %v3884_v59 }
  0xe0   : > { %3007 = vmatmul.msk.f32.gmra.mxu1 %vm171_vm1, %v3786_v49 }
  0xe1   : > { %v3818_v9 = vpop.f32.mrf.mxu2 }
  0xe2   : > { %v3820_v10 = vpop.f32.mrf.mxu3  ;;  %v3822_v11 = vpop.f32.mrf.mxu0 }
  0xe3   : > { %4525 = vst [vmem:[#allocation14_spill] sm:$0xff] %v3820_v10 }
  0xe5   : > { %v3828_v56 = vpop.f32.mrf.mxu1  ;;  %3109 = vmatmul.msk.f32.gmra.mxu0 %vm171_vm1, %v3616_v63 }
  0xe6   : > { %3041 = vmatmul.msk.f32.gmra.mxu2 %vm171_vm1, %v3824_v15  ;;  %v3864_v15 = vld [vmem:[#allocation2 + $0xaa] sm:$0xff] }
  0xe7   : > { %3075 = vmatmul.msk.f32.gmra.mxu3 %vm171_vm1, %v3826_v16  ;;  %4534 = vst [vmem:[#allocation23_spill] sm:$0xff] %v3864_v15 }
  0xe8   : > { %3008 = vmatmul.msk.f32.gmra.mxu1 %vm171_vm1, %v3806_v0 }
  0xe9   : > { %v3838_v17 = vpop.f32.mrf.mxu2 }
  0xea   : > { %4528 = vst [vmem:[#allocation17_spill] sm:$0xff] %v3838_v17  ;;  %v3840_v10 = vpop.f32.mrf.mxu3  ;;  %v3842_v57 = vpop.f32.mrf.mxu0  ;;  %v3915_v17 = vld [vmem:[#allocation2 + $0xe0] sm:$0xff] }
  0xeb   : > { %4529 = vst [vmem:[#allocation18_spill] sm:$0xff] %v3840_v10 }
  0xed   : > { %v3848_v63 = vpop.f32.mrf.mxu1  ;;  %3110 = vmatmul.msk.f32.gmra.mxu0 %vm171_vm1, %v3636_v5 }
  0xee   : > { %3042 = vmatmul.msk.f32.gmra.mxu2 %vm171_vm1, %v3844_v45 }
  0xef   : > { %3076 = vmatmul.msk.f32.gmra.mxu3 %vm171_vm1, %v3846_v39 }
  0xf0   : > { %3009 = vmatmul.msk.f32.gmra.mxu1 %vm171_vm1, %v3826_v16 }
  0xf1   : > { %v3858_v10 = vpop.f32.mrf.mxu2 }
  0xf2   : > { %4532 = vst [vmem:[#allocation21_spill] sm:$0xff] %v3858_v10  ;;  %v3860_v0 = vpop.f32.mrf.mxu3  ;;  %v3862_v49 = vpop.f32.mrf.mxu0 }
  0xf3   : > { %4533 = vst [vmem:[#allocation22_spill] sm:$0xff] %v3860_v0 }
  0xf5   : > { %v3868_v5 = vpop.f32.mrf.mxu1  ;;  %3111 = vmatmul.msk.f32.gmra.mxu0 %vm171_vm1, %v3445_v12 }
  0xf6   : > { %3043 = vmatmul.msk.f32.gmra.mxu2 %vm171_vm1, %v3864_v15 }
  0xf7   : > { %3077 = vmatmul.msk.f32.gmra.mxu3 %vm171_vm1, %v3866_v43 }
  0xf8   : > { %3010 = vmatmul.msk.f32.gmra.mxu1 %vm171_vm1, %v3846_v39 }
  0xf9   : > { %v3878_v0 = vpop.f32.mrf.mxu2 }
  0xfa   : > { %4536 = vst [vmem:[#allocation25_spill] sm:$0xff] %v3878_v0  ;;  %v3880_v16 = vpop.f32.mrf.mxu3  ;;  %v3882_v45 = vpop.f32.mrf.mxu0  ;;  %v3900_v0 = vld [vmem:[#allocation2 + $0xc2] sm:$0xff] }
  0xfb   : > { %4537 = vst [vmem:[#allocation26_spill] sm:$0xff] %v3880_v16 }
  0xfc   : > { %4541 = vst [vmem:[#allocation30_spill] sm:$0xff] %v3900_v0 }
  0xfd   : > { %v688_v12 = vpop.f32.mrf.mxu1  ;;  %3112 = vmatmul.msk.f32.gmra.mxu0 %vm171_vm1, %v3503_v26 }
  0xfe   : > { %3044 = vmatmul.msk.f32.gmra.mxu2 %vm171_vm1, %v3884_v59  ;;  %v689_v26 = vadd.f32 %v688_v12, %v3738_v3 }
  0xff   : > { %3078 = vmatmul.msk.f32.gmra.mxu3 %vm171_vm1, %v3886_v38 }
 0x100   : > { %3011 = vmatmul.msk.f32.gmra.mxu1 %vm171_vm1, %v3866_v43 }
 0x101   : > { %v3896_v16 = vpop.f32.mrf.mxu2 }
 0x102   : > { %4539 = vst [vmem:[#allocation28_spill] sm:$0xff] %v3896_v16  ;;  %v3898_v39 = vpop.f32.mrf.mxu3  ;;  %v1490_v15 = vpop.f32.mrf.mxu0 }
 0x103   : > { %4540 = vst [vmem:[#allocation29_spill] sm:$0xff] %v3898_v39 }
 0x105   : > { %v691_v10 = vpop.f32.mrf.mxu1  ;;  %3113 = vmatmul.msk.f32.gmra.mxu0 %vm171_vm1, %v3527_v35 }
 0x106   : > { %3045 = vmatmul.msk.f32.gmra.mxu2 %vm171_vm1, %v3900_v0  ;;  %v692_v3 = vadd.f32 %v691_v10, %v3762_v41 }
 0x107   : > { %3079 = vmatmul.msk.f32.gmra.mxu3 %vm171_vm1, %v3902_v47 }
 0x108   : > { %3012 = vmatmul.msk.f32.gmra.mxu1 %vm171_vm1, %v3886_v38 }
 0x109   : > { %v934_v39 = vpop.f32.mrf.mxu2 }
 0x10a   : > { %v1030_v43 = vadd.f32 %v934_v39, %v689_v26  ;;  %v1212_v59 = vpop.f32.mrf.mxu3  ;;  %v1493_v16 = vpop.f32.mrf.mxu0  ;;  %v3928_v26 = vld [vmem:[#allocation2 + $0xda] sm:$0xff] }
 0x10c   : > { %v1308_v42 = vadd.f32 %v1212_v59, %v1030_v43 }
 0x10d   : > { %v694_v35 = vpop.f32.mrf.mxu1  ;;  %3114 = vmatmul.msk.f32.gmra.mxu0 %vm171_vm1, %v3561_v48 }
 0x10e   : > { %v3919_v0 = vadd.f32 %v1490_v15, %v1308_v42  ;;  %3046 = vmatmul.msk.f32.gmra.mxu2 %vm171_vm1, %v3913_v33  ;;  %v3930_v42 = vld [vmem:[#allocation2 + $0xf0] sm:$0xff]  ;;  %v695_v41 = vadd.f32 %v694_v35, %v3782_v46 }
 0x10f   : > { %3080 = vmatmul.msk.f32.gmra.mxu3 %vm171_vm1, %v3915_v17 }
 0x110   : > { %4542 = vst [vmem:[#allocation31_spill] sm:$0xff] %v3919_v0  ;;  %3013 = vmatmul.msk.f32.gmra.mxu1 %vm171_vm1, %v3902_v47 }
 0x111   : > { %v937_v39 = vpop.f32.mrf.mxu2 }
 0x112   : > { %v1031_v43 = vadd.f32 %v937_v39, %v692_v3  ;;  %v1215_v59 = vpop.f32.mrf.mxu3  ;;  %v1496_v12 = vpop.f32.mrf.mxu0 }
 0x114   : > { %v1309_v48 = vadd.f32 %v1215_v59, %v1031_v43  ;;  %v3943_v59 = vld [vmem:[#allocation2 + $0xe2] sm:$0xff] }
 0x115   : > { %v697_v15 = vpop.f32.mrf.mxu1  ;;  %3115 = vmatmul.msk.f32.gmra.mxu0 %vm171_vm1, %v3584_v54 }
 0x116   : > { %v3934_v0 = vadd.f32 %v1493_v16, %v1309_v48  ;;  %3047 = vmatmul.msk.f32.gmra.mxu2 %vm171_vm1, %v3928_v26  ;;  %v3945_v16 = vld [vmem:[#allocation2 + $0xf8] sm:$0xff]  ;;  %v698_v46 = vadd.f32 %v697_v15, %v3802_v58 }
 0x117   : > { %3081 = vmatmul.msk.f32.gmra.mxu3 %vm171_vm1, %v3930_v42 }
 0x118   : > { %4543 = vst [vmem:[#allocation32_spill] sm:$0xff] %v3934_v0  ;;  %3014 = vmatmul.msk.f32.gmra.mxu1 %vm171_vm1, %v3915_v17 }
 0x119   : > { %v940_v10 = vpop.f32.mrf.mxu2 }
 0x11a   : > { %v1032_v3 = vadd.f32 %v940_v10, %v695_v41  ;;  %v1218_v39 = vpop.f32.mrf.mxu3  ;;  %v1499_v43 = vpop.f32.mrf.mxu0 }
 0x11c   : > { %v1310_v54 = vadd.f32 %v1218_v39, %v1032_v3  ;;  %v3958_v39 = vld [vmem:[#allocation2 + $0xf2] sm:$0xff] }
 0x11d   : > { %v700_v48 = vpop.f32.mrf.mxu1  ;;  %3116 = vmatmul.msk.f32.gmra.mxu0 %vm171_vm1, %v3612_v61 }
 0x11e   : > { %v3949_v0 = vadd.f32 %v1496_v12, %v1310_v54  ;;  %3048 = vmatmul.msk.f32.gmra.mxu2 %vm171_vm1, %v3943_v59  ;;  %v3960_v12 = vld [vmem:[#allocation2 + $0x108] sm:$0xff]  ;;  %v701_v58 = vadd.f32 %v700_v48, %v3822_v11 }
 0x11f   : > { %3082 = vmatmul.msk.f32.gmra.mxu3 %vm171_vm1, %v3945_v16 }
 0x120   : > { %4544 = vst [vmem:[#allocation33_spill] sm:$0xff] %v3949_v0  ;;  %3015 = vmatmul.msk.f32.gmra.mxu1 %vm171_vm1, %v3930_v42 }
 0x121   : > { %v943_v35 = vpop.f32.mrf.mxu2 }
 0x122   : > { %v1033_v41 = vadd.f32 %v943_v35, %v698_v46  ;;  %v1221_v10 = vpop.f32.mrf.mxu3  ;;  %v1502_v3 = vpop.f32.mrf.mxu0 }
 0x124   : > { %v1311_v61 = vadd.f32 %v1221_v10, %v1033_v41  ;;  %v3973_v10 = vld [vmem:[#allocation2 + $0xfa] sm:$0xff] }
 0x125   : > { %v703_v54 = vpop.f32.mrf.mxu1  ;;  %3117 = vmatmul.msk.f32.gmra.mxu0 %vm171_vm1, %v3632_v2 }
 0x126   : > { %v3964_v0 = vadd.f32 %v1499_v43, %v1311_v61  ;;  %3049 = vmatmul.msk.f32.gmra.mxu2 %vm171_vm1, %v3958_v39  ;;  %v3975_v43 = vld [vmem:[#allocation2 + $0x110] sm:$0xff]  ;;  %v704_v11 = vadd.f32 %v703_v54, %v3842_v57 }
 0x127   : > { %3083 = vmatmul.msk.f32.gmra.mxu3 %vm171_vm1, %v3960_v12 }
 0x128   : > { %4545 = vst [vmem:[#allocation34_spill] sm:$0xff] %v3964_v0  ;;  %3016 = vmatmul.msk.f32.gmra.mxu1 %vm171_vm1, %v3945_v16 }
 0x129   : > { %v946_v15 = vpop.f32.mrf.mxu2 }
 0x12a   : > { %v1034_v46 = vadd.f32 %v946_v15, %v701_v58  ;;  %v1224_v35 = vpop.f32.mrf.mxu3  ;;  %v1505_v41 = vpop.f32.mrf.mxu0 }
 0x12c   : > { %v1312_v2 = vadd.f32 %v1224_v35, %v1034_v46  ;;  %v3988_v35 = vld [vmem:[#allocation2 + $0x10a] sm:$0xff] }
 0x12d   : > { %v706_v61 = vpop.f32.mrf.mxu1  ;;  %3118 = vmatmul.msk.f32.gmra.mxu0 %vm171_vm1, %v3648_v7 }
 0x12e   : > { %v3979_v0 = vadd.f32 %v1502_v3, %v1312_v2  ;;  %3050 = vmatmul.msk.f32.gmra.mxu2 %vm171_vm1, %v3973_v10  ;;  %v3990_v3 = vld [vmem:[#allocation2 + $0x120] sm:$0xff]  ;;  %v707_v57 = vadd.f32 %v706_v61, %v3862_v49 }
 0x12f   : > { %3084 = vmatmul.msk.f32.gmra.mxu3 %vm171_vm1, %v3975_v43 }
 0x130   : > { %4546 = vst [vmem:[#allocation35_spill] sm:$0xff] %v3979_v0  ;;  %3017 = vmatmul.msk.f32.gmra.mxu1 %vm171_vm1, %v3960_v12 }
 0x131   : > { %v949_v48 = vpop.f32.mrf.mxu2 }
 0x132   : > { %v1035_v58 = vadd.f32 %v949_v48, %v704_v11  ;;  %v1227_v15 = vpop.f32.mrf.mxu3  ;;  %v1508_v46 = vpop.f32.mrf.mxu0 }
 0x134   : > { %v1313_v7 = vadd.f32 %v1227_v15, %v1035_v58  ;;  %v4003_v15 = vld [vmem:[#allocation2 + $0x112] sm:$0xff] }
 0x135   : > { %v709_v2 = vpop.f32.mrf.mxu1  ;;  %3119 = vmatmul.msk.f32.gmra.mxu0 %vm171_vm1, %v3451_v13 }
 0x136   : > { %v3994_v0 = vadd.f32 %v1505_v41, %v1313_v7  ;;  %3051 = vmatmul.msk.f32.gmra.mxu2 %vm171_vm1, %v3988_v35  ;;  %v4005_v41 = vld [vmem:[#allocation2 + $0x128] sm:$0xff]  ;;  %v710_v49 = vadd.f32 %v709_v2, %v3882_v45 }
 0x137   : > { %3085 = vmatmul.msk.f32.gmra.mxu3 %vm171_vm1, %v3990_v3  ;;  %4548 = vst [vmem:[#allocation37_spill] sm:$0xff] %v4005_v41 }
 0x138   : > { %4547 = vst [vmem:[#allocation36_spill] sm:$0xff] %v3994_v0  ;;  %3018 = vmatmul.msk.f32.gmra.mxu1 %vm171_vm1, %v3975_v43 }
 0x139   : > { %v952_v54 = vpop.f32.mrf.mxu2 }
 0x13a   : > { %v1036_v11 = vadd.f32 %v952_v54, %v707_v57  ;;  %v1230_v48 = vpop.f32.mrf.mxu3  ;;  %v1511_v58 = vpop.f32.mrf.mxu0 }
 0x13c   : > { %v1314_v13 = vadd.f32 %v1230_v48, %v1036_v11  ;;  %v4018_v48 = vld [vmem:[#allocation2 + $0x122] sm:$0xff] }
 0x13d   : > { %v712_v7 = vpop.f32.mrf.mxu1  ;;  %3120 = vmatmul.msk.f32.gmra.mxu0 %vm171_vm1, %v3509_v28 }
 0x13e   : > { %v4009_v0 = vadd.f32 %v1508_v46, %v1314_v13  ;;  %3052 = vmatmul.msk.f32.gmra.mxu2 %vm171_vm1, %v4003_v15  ;;  %v1086_v46 = vld [vmem:[#allocation2 + $0x138] sm:$0xff]  ;;  %v713_v45 = vadd.f32 %v712_v7, %v3728_v31  ;;  %v257_v31 = vld [vmem:[%s3342_s19 + $0xf0] sm:$0xff] }
 0x13f   : > { %3086 = vmatmul.msk.f32.gmra.mxu3 %vm171_vm1, %v4005_v41  ;;  %290 = vst.msk [vmem:[#allocation2 + $0x181] sm:$0xff] %vm171_vm1, %v257_v31 }
 0x140   : > { %4549 = vst [vmem:[#allocation38_spill] sm:$0xff] %v4009_v0  ;;  %3019 = vmatmul.msk.f32.gmra.mxu1 %vm171_vm1, %v3990_v3 }
 0x141   : > { %v955_v61 = vpop.f32.mrf.mxu2 }
 0x142   : > { %v1037_v57 = vadd.f32 %v955_v61, %v710_v49  ;;  %v1233_v54 = vpop.f32.mrf.mxu3  ;;  %v1514_v11 = vpop.f32.mrf.mxu0 }
 0x144   : > { %v1315_v28 = vadd.f32 %v1233_v54, %v1037_v57  ;;  %v4030_v54 = vld [vmem:[#allocation2 + $0x12a] sm:$0xff] }
 0x145   : > { %v715_v13 = vpop.f32.mrf.mxu1  ;;  %3121 = vmatmul.msk.f32.gmra.mxu0 %vm171_vm1, %v3531_v37 }
 0x146   : > { %v4022_v0 = vadd.f32 %v1511_v58, %v1315_v28  ;;  %3053 = vmatmul.msk.f32.gmra.mxu2 %vm171_vm1, %v4018_v48  ;;  %v1087_v58 = vld [vmem:[#allocation2 + $0x140] sm:$0xff]  ;;  %v716_v7 = vadd.f32 %v715_v13, %v3746_v36  ;;  %v258_v36 = vld [vmem:[%s3342_s19 + $0xf8] sm:$0xff] }
 0x147   : > { %3087 = vmatmul.msk.f32.gmra.mxu3 %vm171_vm1, %v1086_v46  ;;  %291 = vst.msk [vmem:[#allocation2 + $0x189] sm:$0xff] %vm171_vm1, %v258_v36 }
 0x148   : > { %4550 = vst [vmem:[#allocation39_spill] sm:$0xff] %v4022_v0  ;;  %3020 = vmatmul.msk.f32.gmra.mxu1 %vm171_vm1, %v4005_v41 }
 0x149   : > { %v958_v2 = vpop.f32.mrf.mxu2 }
 0x14a   : > { %v1038_v49 = vadd.f32 %v958_v2, %v713_v45  ;;  %v1236_v61 = vpop.f32.mrf.mxu3  ;;  %v1517_v57 = vpop.f32.mrf.mxu0 }
 0x14c   : > { %v1316_v37 = vadd.f32 %v1236_v61, %v1038_v49 }
 0x14d   : > { %v718_v28 = vpop.f32.mrf.mxu1  ;;  %3122 = vmatmul.msk.f32.gmra.mxu0 %vm171_vm1, %v3565_v50  ;;  %v4043_v50 = vld [vmem:[#allocation2 + $0x13a] sm:$0xff] }
 0x14e   : > { %v4034_v0 = vadd.f32 %v1514_v11, %v1316_v37  ;;  %3054 = vmatmul.msk.f32.gmra.mxu2 %vm171_vm1, %v4030_v54  ;;  %v1088_v37 = vld [vmem:[#allocation2 + $0x150] sm:$0xff] }
 0x14f   : > { %3088 = vmatmul.msk.f32.gmra.mxu3 %vm171_vm1, %v1087_v58 }
 0x150   : > { %4551 = vst [vmem:[#allocation40_spill] sm:$0xff] %v4034_v0  ;;  %3021 = vmatmul.msk.f32.gmra.mxu1 %vm171_vm1, %v1086_v46  ;;  %v719_v46 = vadd.f32 %v718_v28, %v3768_v30 }
 0x151   : > { %v961_v45 = vpop.f32.mrf.mxu2 }
 0x152   : > { %v1039_v2 = vadd.f32 %v961_v45, %v716_v7  ;;  %v1239_v49 = vpop.f32.mrf.mxu3  ;;  %v1520_v61 = vpop.f32.mrf.mxu0 }
 0x154   : > { %v1317_v11 = vadd.f32 %v1239_v49, %v1039_v2  ;;  %v811_v2 = vld [vmem:[#allocation2 + $0x142] sm:$0xff] }
 0x155   : > { %v721_v0 = vpop.f32.mrf.mxu1  ;;  %3123 = vmatmul.msk.f32.gmra.mxu0 %vm171_vm1, %v3586_v55 }
 0x156   : > { %v4047_v41 = vadd.f32 %v1517_v57, %v1317_v11  ;;  %3055 = vmatmul.msk.f32.gmra.mxu2 %vm171_vm1, %v4043_v50  ;;  %v1089_v57 = vld [vmem:[#allocation2 + $0x158] sm:$0xff]  ;;  %v722_v30 = vadd.f32 %v721_v0, %v3788_v40 }
 0x157   : > { %3089 = vmatmul.msk.f32.gmra.mxu3 %vm171_vm1, %v1088_v37 }
 0x158   : > { %4552 = vst [vmem:[#allocation41_spill] sm:$0xff] %v4047_v41  ;;  %3022 = vmatmul.msk.f32.gmra.mxu1 %vm171_vm1, %v1087_v58 }
 0x159   : > { %v964_v13 = vpop.f32.mrf.mxu2 }
 0x15a   : > { %v1040_v31 = vadd.f32 %v964_v13, %v719_v46  ;;  %v1242_v7 = vpop.f32.mrf.mxu3  ;;  %v1523_v45 = vpop.f32.mrf.mxu0  ;;  %v812_v13 = vld [vmem:[#allocation2 + $0x152] sm:$0xff] }
 0x15c   : > { %v1318_v55 = vadd.f32 %v1242_v7, %v1040_v31  ;;  %v1090_v7 = vld [vmem:[#allocation2 + $0x168] sm:$0xff] }
 0x15d   : > { %v724_v49 = vpop.f32.mrf.mxu1  ;;  %3124 = vmatmul.msk.f32.gmra.mxu0 %vm171_vm1, %v3614_v62 }
 0x15e   : > { %v4058_v11 = vadd.f32 %v1520_v61, %v1318_v55  ;;  %3056 = vmatmul.msk.f32.gmra.mxu2 %vm171_vm1, %v811_v2  ;;  %v725_v40 = vadd.f32 %v724_v49, %v3808_v51  ;;  %v813_v55 = vld [vmem:[#allocation2 + $0x15a] sm:$0xff] }
 0x15f   : > { %3090 = vmatmul.msk.f32.gmra.mxu3 %vm171_vm1, %v1089_v57 }
 0x160   : > { %3023 = vmatmul.msk.f32.gmra.mxu1 %vm171_vm1, %v1088_v37 }
 0x161   : > { %v967_v58 = vpop.f32.mrf.mxu2 }
 0x162   : > { %v1041_v28 = vadd.f32 %v967_v58, %v722_v30  ;;  %v1245_v36 = vpop.f32.mrf.mxu3  ;;  %v1526_v46 = vpop.f32.mrf.mxu0  ;;  %v1091_v58 = vld [vmem:[#allocation2 + $0x170] sm:$0xff] }
 0x164   : > { %v1319_v31 = vadd.f32 %v1245_v36, %v1041_v28 }
 0x165   : > { %v727_v41 = vpop.f32.mrf.mxu1  ;;  %3125 = vmatmul.msk.f32.gmra.mxu0 %vm171_vm1, %v3634_v4 }
 0x166   : > { %v4066_v62 = vadd.f32 %v1523_v45, %v1319_v31  ;;  %3057 = vmatmul.msk.f32.gmra.mxu2 %vm171_vm1, %v812_v13  ;;  %v728_v51 = vadd.f32 %v727_v41, %v3828_v56  ;;  %v1370_v13 = vld [vmem:[#allocation2 + $0x181] sm:$0xff]  ;;  %v814_v31 = vld [vmem:[#allocation2 + $0x16a] sm:$0xff] }
 0x167   : > { %3091 = vmatmul.msk.f32.gmra.mxu3 %vm171_vm1, %v1090_v7 }
 0x168   : > { %3024 = vmatmul.msk.f32.gmra.mxu1 %vm171_vm1, %v1089_v57 }
 0x169   : > { %v970_v0 = vpop.f32.mrf.mxu2 }
 0x16a   : > { %v1042_v61 = vadd.f32 %v970_v0, %v725_v40  ;;  %v1248_v37 = vpop.f32.mrf.mxu3  ;;  %v1529_v2 = vpop.f32.mrf.mxu0  ;;  %v1092_v0 = vld [vmem:[#allocation2 + $0x180] sm:$0xff] }
 0x16c   : > { %v1320_v30 = vadd.f32 %v1248_v37, %v1042_v61 }
 0x16d   : > { %v730_v28 = vpop.f32.mrf.mxu1  ;;  %3126 = vmatmul.msk.f32.gmra.mxu0 %vm171_vm1, %v3650_v8 }
 0x16e   : > { %v4074_v4 = vadd.f32 %v1526_v46, %v1320_v30  ;;  %3058 = vmatmul.msk.f32.gmra.mxu2 %vm171_vm1, %v813_v55  ;;  %v731_v56 = vadd.f32 %v730_v28, %v3848_v63  ;;  %v1371_v55 = vld [vmem:[#allocation2 + $0x189] sm:$0xff]  ;;  %v815_v30 = vld [vmem:[#allocation2 + $0x172] sm:$0xff] }
 0x16f   : > { %3092 = vmatmul.msk.f32.gmra.mxu3 %vm171_vm1, %v1091_v58 }
 0x170   : > { %3025 = vmatmul.msk.f32.gmra.mxu1 %vm171_vm1, %v1090_v7 }
 0x171   : > { %v973_v45 = vpop.f32.mrf.mxu2 }
 0x172   : > { %v1043_v57 = vadd.f32 %v973_v45, %v728_v51  ;;  %v1251_v49 = vpop.f32.mrf.mxu3  ;;  %v1532_v36 = vpop.f32.mrf.mxu0  ;;  %v1093_v45 = vld [vmem:[#allocation2 + $0x188] sm:$0xff] }
 0x174   : > { %v1321_v40 = vadd.f32 %v1251_v49, %v1043_v57 }
 0x175   : > { %v733_v61 = vpop.f32.mrf.mxu1  ;;  %3127 = vmatmul.msk.f32.gmra.mxu0 %vm171_vm1, %v1370_v13 }
 0x176   : > { %v4081_v8 = vadd.f32 %v1529_v2, %v1321_v40  ;;  %3059 = vmatmul.msk.f32.gmra.mxu2 %vm171_vm1, %v814_v31  ;;  %v734_v63 = vadd.f32 %v733_v61, %v3868_v5 }
 0x177   : > { %3093 = vmatmul.msk.f32.gmra.mxu3 %vm171_vm1, %v1092_v0 }
 0x178   : > { %3026 = vmatmul.msk.f32.gmra.mxu1 %vm171_vm1, %v1091_v58 }
 0x179   : > { %v976_v41 = vpop.f32.mrf.mxu2 }
 0x17a   : > { %v1044_v46 = vadd.f32 %v976_v41, %v731_v56  ;;  %v1254_v7 = vpop.f32.mrf.mxu3  ;;  %v1535_v37 = vpop.f32.mrf.mxu0 }
 0x17c   : > { %v1322_v51 = vadd.f32 %v1254_v7, %v1044_v46 }
 0x17d   : > { %v736_v57 = vpop.f32.mrf.mxu1  ;;  %3128 = vmatmul.msk.f32.gmra.mxu0 %vm171_vm1, %v1371_v55 }
 0x17e   : > { %v4088_v2 = vadd.f32 %v1532_v36, %v1322_v51  ;;  %3060 = vmatmul.msk.f32.gmra.mxu2 %vm171_vm1, %v815_v30  ;;  %v737_v5 = vadd.f32 %v736_v57, %v3756_v14 }
 0x17f   : > { %3094 = vmatmul.msk.f32.gmra.mxu3 %vm171_vm1, %v1093_v45 }
 0x180   : > { %3131 = vmatmul.msk.f32.vlgmr.msra.gmra.mxu1 %vm171_vm1, %v3669_v18 }
 0x181   : > { %v979_v58 = vpop.f32.mrf.mxu2 }
 0x182   : > { %v1045_v28 = vadd.f32 %v979_v58, %v734_v63  ;;  %v1257_v49 = vpop.f32.mrf.mxu3  ;;  %v1538_v13 = vpop.f32.mrf.mxu0 }
 0x184   : > { %v1323_v31 = vadd.f32 %v1257_v49, %v1045_v28 }
 0x185   : > { %v739_v40 = vpop.f32.mrf.mxu1  ;;  %3233 = vmatmul.msk.f32.vlgmr.msra.gmra.mxu0 %vm171_vm1, %v3692_v22 }
 0x186   : > { %v4097_v36 = vadd.f32 %v1535_v37, %v1323_v31  ;;  %3165 = vmatmul.msk.f32.vlgmr.msra.gmra.mxu2 %vm171_vm1, %v3671_v19 }
 0x187   : > { %3199 = vmatmul.msk.f32.vlgmr.msra.gmra.mxu3 %vm171_vm1, %v3582_v53  ;;  %v740_v53 = vadd.f32 %v739_v40, %v3778_v44 }
 0x188   : > { %3132 = vmatmul.msk.f32.gmra.mxu1 %vm171_vm1, %v3680_v20 }
 0x189   : > { %v982_v18 = vpop.f32.mrf.mxu2 }
 0x18a   : > { %v1046_v0 = vadd.f32 %v982_v18, %v737_v5  ;;  %v1260_v61 = vpop.f32.mrf.mxu3  ;;  %v1541_v56 = vpop.f32.mrf.mxu0 }
 0x18c   : > { %v1324_v41 = vadd.f32 %v1260_v61, %v1046_v0  ;;  %v2180_v61 = vld [vmem:[#allocation2 + $0x69] sm:$0xff] }
 0x18d   : > { %v742_v46 = vpop.f32.mrf.mxu1  ;;  %3234 = vmatmul.msk.f32.gmra.mxu0 %vm171_vm1, %v3704_v24 }
 0x18e   : > { %v4108_v7 = vadd.f32 %v1538_v13, %v1324_v41  ;;  %3166 = vmatmul.msk.f32.gmra.mxu2 %vm171_vm1, %v3682_v21  ;;  %v2179_v13 = vld [vmem:[#allocation2 + $0x61] sm:$0xff] }
 0x18f   : > { %3200 = vmatmul.msk.f32.gmra.mxu3 %vm171_vm1, %v3610_v60  ;;  %v743_v60 = vadd.f32 %v742_v46, %v3798_v52  ;;  %v4554_v41 = vld [vmem:[#allocation6_spill] sm:$0xff] }
 0x190   : > { %3133 = vmatmul.msk.f32.gmra.mxu1 %vm171_vm1, %v3692_v22 }
 0x191   : > { %v985_v19 = vpop.f32.mrf.mxu2 }
 0x192   : > { %v1047_v20 = vadd.f32 %v985_v19, %v740_v53  ;;  %v1263_v14 = vpop.f32.mrf.mxu3  ;;  %v1544_v37 = vpop.f32.mrf.mxu0  ;;  %v4556_v53 = vld [vmem:[#allocation21_spill] sm:$0xff] }
 0x194   : > { %v1325_v55 = vadd.f32 %v1263_v14, %v1047_v20 }
 0x195   : > { %v745_v30 = vpop.f32.mrf.mxu1  ;;  %3235 = vmatmul.msk.f32.gmra.mxu0 %vm171_vm1, %v3716_v27 }
 0x196   : > { %v4119_v51 = vadd.f32 %v1541_v56, %v1325_v55  ;;  %3167 = vmatmul.msk.f32.gmra.mxu2 %vm171_vm1, %v3694_v23 }
 0x197   : > { %3201 = vmatmul.msk.f32.gmra.mxu3 %vm171_vm1, %v3630_v1  ;;  %v746_v1 = vadd.f32 %v745_v30, %v3818_v9  ;;  %v2181_v30 = vld [vmem:[#allocation2 + $0x79] sm:$0xff] }
 0x198   : > { %3134 = vmatmul.msk.f32.gmra.mxu1 %vm171_vm1, %v3704_v24 }
 0x199   : > { %v988_v21 = vpop.f32.mrf.mxu2 }
 0x19a   : > { %v1048_v22 = vadd.f32 %v988_v21, %v743_v60  ;;  %v1266_v44 = vpop.f32.mrf.mxu3  ;;  %v1547_v45 = vpop.f32.mrf.mxu0  ;;  %v4557_v21 = vld [vmem:[#allocation9_spill] sm:$0xff] }
 0x19c   : > { %v1326_v57 = vadd.f32 %v1266_v44, %v1048_v22  ;;  %v4558_v44 = vld [vmem:[#allocation4_spill] sm:$0xff] }
 0x19d   : > { %v748_v63 = vpop.f32.mrf.mxu1  ;;  %3236 = vmatmul.msk.f32.gmra.mxu0 %vm171_vm1, %v3730_v32 }
 0x19e   : > { %v4130_v58 = vadd.f32 %v1544_v37, %v1326_v57  ;;  %3168 = vmatmul.msk.f32.gmra.mxu2 %vm171_vm1, %v3706_v25 }
 0x19f   : > { %3202 = vmatmul.msk.f32.gmra.mxu3 %vm171_vm1, %v3646_v6  ;;  %v4553_v6 = vld [vmem:[#allocation17_spill] sm:$0xff] }
 0x1a0   : > { %3135 = vmatmul.msk.f32.gmra.mxu1 %vm171_vm1, %v3716_v27  ;;  %v749_v25 = vadd.f32 %v748_v63, %v4553_v6  ;;  %v4562_v6 = vld [vmem:[#allocation28_spill] sm:$0xff] }
 0x1a1   : > { %v991_v23 = vpop.f32.mrf.mxu2 }
 0x1a2   : > { %v1049_v24 = vadd.f32 %v991_v23, %v746_v1  ;;  %v1269_v52 = vpop.f32.mrf.mxu3  ;;  %v1550_v28 = vpop.f32.mrf.mxu0 }
 0x1a4   : > { %v1327_v49 = vadd.f32 %v1269_v52, %v1049_v24  ;;  %v2182_v52 = vld [vmem:[#allocation2 + $0x81] sm:$0xff] }
 0x1a5   : > { %v751_v31 = vpop.f32.mrf.mxu1  ;;  %3237 = vmatmul.msk.f32.gmra.mxu0 %vm171_vm1, %v3744_v34 }
 0x1a6   : > { %v4141_v40 = vadd.f32 %v1547_v45, %v1327_v49  ;;  %3169 = vmatmul.msk.f32.gmra.mxu2 %vm171_vm1, %v3718_v29  ;;  %v4555_v29 = vld [vmem:[#allocation3_spill] sm:$0xff]  ;;  %v752_v19 = vadd.f32 %v751_v31, %v4556_v53  ;;  %v4559_v45 = vld [vmem:[#allocation25_spill] sm:$0xff]  ;;  %v4560_v49 = vld [vmem:[#allocation12_spill] sm:$0xff] }
 0x1a7   : > { %3203 = vmatmul.msk.f32.gmra.mxu3 %vm171_vm1, %v2179_v13  ;;  %v4561_v31 = vld [vmem:[#allocation7_spill] sm:$0xff]  ;;  %v4564_v53 = vld [vmem:[#allocation10_spill] sm:$0xff] }
 0x1a8   : > { %3136 = vmatmul.msk.f32.gmra.mxu1 %vm171_vm1, %v3730_v32 }
 0x1a9   : > { %v994_v27 = vpop.f32.mrf.mxu2 }
 0x1aa   : > { %v1050_v9 = vadd.f32 %v994_v27, %v749_v25  ;;  %v1272_v5 = vpop.f32.mrf.mxu3  ;;  %v1553_v18 = vpop.f32.mrf.mxu0 }
 0x1ac   : > { %v1328_v0 = vadd.f32 %v1272_v5, %v1050_v9 }
 0x1ad   : > { %v754_v56 = vpop.f32.mrf.mxu1  ;;  %3238 = vmatmul.msk.f32.gmra.mxu0 %vm171_vm1, %v4554_v41 }
 0x1ae   : > { %v4151_v46 = vadd.f32 %v1550_v28, %v1328_v0  ;;  %3170 = vmatmul.msk.f32.gmra.mxu2 %vm171_vm1, %v4555_v29  ;;  %v755_v57 = vadd.f32 %v754_v56, %v4559_v45 }
 0x1af   : > { %3204 = vmatmul.msk.f32.gmra.mxu3 %vm171_vm1, %v2180_v61  ;;  %v2183_v61 = vld [vmem:[#allocation2 + $0x91] sm:$0xff] }
 0x1b0   : > { %3137 = vmatmul.msk.f32.gmra.mxu1 %vm171_vm1, %v3744_v34 }
 0x1b1   : > { %v997_v32 = vpop.f32.mrf.mxu2 }
 0x1b2   : > { %v1051_v20 = vadd.f32 %v997_v32, %v752_v19  ;;  %v1275_v14 = vpop.f32.mrf.mxu3  ;;  %v1556_v37 = vpop.f32.mrf.mxu0  ;;  %v4565_v19 = vld [vmem:[#allocation5_spill] sm:$0xff] }
 0x1b4   : > { %v1329_v55 = vadd.f32 %v1275_v14, %v1051_v20 }
 0x1b5   : > { %v757_v60 = vpop.f32.mrf.mxu1  ;;  %3239 = vmatmul.msk.f32.gmra.mxu0 %vm171_vm1, %v4557_v21 }
 0x1b6   : > { %v4161_v22 = vadd.f32 %v1553_v18, %v1329_v55  ;;  %3171 = vmatmul.msk.f32.gmra.mxu2 %vm171_vm1, %v4558_v44  ;;  %v758_v25 = vadd.f32 %v757_v60, %v4562_v6  ;;  %v2184_v60 = vld [vmem:[#allocation2 + $0x99] sm:$0xff]  ;;  %v4566_v44 = vld [vmem:[#allocation19_spill] sm:$0xff] }
 0x1b7   : > { %3205 = vmatmul.msk.f32.gmra.mxu3 %vm171_vm1, %v2181_v30  ;;  %v4569_v6 = vld [vmem:[#allocation23_spill] sm:$0xff] }
 0x1b8   : > { %3138 = vmatmul.msk.f32.gmra.mxu1 %vm171_vm1, %v4554_v41  ;;  %v4563_v41 = vld [vmem:[#allocation15_spill] sm:$0xff] }
 0x1b9   : > { %v1000_v34 = vpop.f32.mrf.mxu2 }
 0x1ba   : > { %v1052_v63 = vadd.f32 %v1000_v34, %v755_v57  ;;  %v1278_v1 = vpop.f32.mrf.mxu3  ;;  %v1559_v23 = vpop.f32.mrf.mxu0  ;;  %v4567_v57 = vld [vmem:[#allocation13_spill] sm:$0xff]  ;;  %v4568_v34 = vld [vmem:[#allocation8_spill] sm:$0xff] }
 0x1bc   : > { %v1330_v24 = vadd.f32 %v1278_v1, %v1052_v63 }
 0x1bd   : > { %v760_v28 = vpop.f32.mrf.mxu1  ;;  %3240 = vmatmul.msk.f32.gmra.mxu0 %vm171_vm1, %v4560_v49 }
 0x1be   : > { %v4171_v13 = vadd.f32 %v1556_v37, %v1330_v24  ;;  %3172 = vmatmul.msk.f32.gmra.mxu2 %vm171_vm1, %v4561_v31  ;;  %v761_v32 = vadd.f32 %v760_v28, %v4565_v19 }
 0x1bf   : > { %3206 = vmatmul.msk.f32.gmra.mxu3 %vm171_vm1, %v2182_v52 }
 0x1c0   : > { %3139 = vmatmul.msk.f32.gmra.mxu1 %vm171_vm1, %v4557_v21 }
 0x1c1   : > { %v1003_v27 = vpop.f32.mrf.mxu2 }
 0x1c2   : > { %v1053_v9 = vadd.f32 %v1003_v27, %v758_v25  ;;  %v1281_v5 = vpop.f32.mrf.mxu3  ;;  %v1562_v18 = vpop.f32.mrf.mxu0  ;;  %v4570_v27 = vld [vmem:[#allocation16_spill] sm:$0xff] }
 0x1c4   : > { %v1331_v0 = vadd.f32 %v1281_v5, %v1053_v9  ;;  %v4571_v9 = vld [vmem:[#allocation11_spill] sm:$0xff] }
 0x1c5   : > { %v763_v56 = vpop.f32.mrf.mxu1  ;;  %3241 = vmatmul.msk.f32.gmra.mxu0 %vm171_vm1, %v4563_v41 }
 0x1c6   : > { %v4181_v29 = vadd.f32 %v1559_v23, %v1331_v0  ;;  %3173 = vmatmul.msk.f32.gmra.mxu2 %vm171_vm1, %v4564_v53  ;;  %v764_v63 = vadd.f32 %v763_v56, %v4568_v34  ;;  %v2186_v53 = vld [vmem:[#allocation2 + $0xb1] sm:$0xff]  ;;  %v2187_v34 = vld [vmem:[#allocation2 + $0xc1] sm:$0xff] }
 0x1c7   : > { %3207 = vmatmul.msk.f32.gmra.mxu3 %vm171_vm1, %v2183_v61 }
 0x1c8   : > { %3140 = vmatmul.msk.f32.gmra.mxu1 %vm171_vm1, %v4560_v49  ;;  %v2185_v49 = vld [vmem:[#allocation2 + $0xa9] sm:$0xff] }
 0x1c9   : > { %v1006_v20 = vpop.f32.mrf.mxu2 }
 0x1ca   : > { %v1054_v14 = vadd.f32 %v1006_v20, %v761_v32  ;;  %v1284_v37 = vpop.f32.mrf.mxu3  ;;  %v1565_v55 = vpop.f32.mrf.mxu0  ;;  %v4572_v32 = vld [vmem:[#allocation27_spill] sm:$0xff] }
 0x1cc   : > { %v1332_v30 = vadd.f32 %v1284_v37, %v1054_v14  ;;  %v4573_v14 = vld [vmem:[#allocation20_spill] sm:$0xff]  ;;  %v4574_v37 = vld [vmem:[#allocation14_spill] sm:$0xff] }
 0x1cd   : > { %v766_v21 = vpop.f32.mrf.mxu1  ;;  %3242 = vmatmul.msk.f32.gmra.mxu0 %vm171_vm1, %v4566_v44 }
 0x1ce   : > { %v4191_v45 = vadd.f32 %v1562_v18, %v1332_v30  ;;  %3174 = vmatmul.msk.f32.gmra.mxu2 %vm171_vm1, %v4567_v57  ;;  %v767_v5 = vadd.f32 %v766_v21, %v4571_v9 }
 0x1cf   : > { %3208 = vmatmul.msk.f32.gmra.mxu3 %vm171_vm1, %v2184_v60 }
 0x1d0   : > { %3141 = vmatmul.msk.f32.gmra.mxu1 %vm171_vm1, %v4563_v41 }
 0x1d1   : > { %v1009_v1 = vpop.f32.mrf.mxu2 }
 0x1d2   : > { %v1055_v23 = vadd.f32 %v1009_v1, %v764_v63  ;;  %v1287_v24 = vpop.f32.mrf.mxu3  ;;  %v1568_v52 = vpop.f32.mrf.mxu0  ;;  %v4575_v1 = vld [vmem:[#allocation30_spill] sm:$0xff] }
 0x1d4   : > { %v1333_v28 = vadd.f32 %v1287_v24, %v1055_v23  ;;  %v4576_v24 = vld [vmem:[#allocation24_spill] sm:$0xff] }
 0x1d5   : > { %v769_v31 = vpop.f32.mrf.mxu1  ;;  %3243 = vmatmul.msk.f32.gmra.mxu0 %vm171_vm1, %v4569_v6 }
 0x1d6   : > { %v4201_v25 = vadd.f32 %v1565_v55, %v1333_v28  ;;  %3175 = vmatmul.msk.f32.gmra.mxu2 %vm171_vm1, %v4570_v27  ;;  %v770_v55 = vadd.f32 %v769_v31, %v4574_v37  ;;  %v2189_v37 = vld [vmem:[#allocation2 + $0xd9] sm:$0xff] }
 0x1d7   : > { %3209 = vmatmul.msk.f32.gmra.mxu3 %vm171_vm1, %v2185_v49 }
 0x1d8   : > { %3142 = vmatmul.msk.f32.gmra.mxu1 %vm171_vm1, %v4566_v44 }
 0x1d9   : > { %v1012_v18 = vpop.f32.mrf.mxu2 }
 0x1da   : > { %v1056_v0 = vadd.f32 %v1012_v18, %v767_v5  ;;  %v1290_v61 = vpop.f32.mrf.mxu3  ;;  %v1571_v56 = vpop.f32.mrf.mxu0  ;;  %v2188_v5 = vld [vmem:[#allocation2 + $0xc9] sm:$0xff] }
 0x1dc   : > { %v1334_v41 = vadd.f32 %v1290_v61, %v1056_v0  ;;  %v4578_v61 = vld [vmem:[#allocation22_spill] sm:$0xff] }
 0x1dd   : > { %v772_v19 = vpop.f32.mrf.mxu1  ;;  %3244 = vmatmul.msk.f32.gmra.mxu0 %vm171_vm1, %v4572_v32 }
 0x1de   : > { %v4211_v20 = vadd.f32 %v1568_v52, %v1334_v41  ;;  %3176 = vmatmul.msk.f32.gmra.mxu2 %vm171_vm1, %v4573_v14  ;;  %v4577_v52 = vld [vmem:[#allocation18_spill] sm:$0xff] }
 0x1df   : > { %3210 = vmatmul.msk.f32.gmra.mxu3 %vm171_vm1, %v2186_v53  ;;  %v773_v28 = vadd.f32 %v772_v19, %v4577_v52 }
 0x1e0   : > { %3143 = vmatmul.msk.f32.gmra.mxu1 %vm171_vm1, %v4569_v6 }
 0x1e1   : > { %v1015_v30 = vpop.f32.mrf.mxu2 }
 0x1e2   : > { %v1057_v60 = vadd.f32 %v1015_v30, %v770_v55  ;;  %v1293_v21 = vpop.f32.mrf.mxu3  ;;  %v1574_v44 = vpop.f32.mrf.mxu0 }
 0x1e4   : > { %v1335_v57 = vadd.f32 %v1293_v21, %v1057_v60 }
 0x1e5   : > { %v775_v63 = vpop.f32.mrf.mxu1  ;;  %3245 = vmatmul.msk.f32.gmra.mxu0 %vm171_vm1, %v4575_v1 }
 0x1e6   : > { %v4221_v23 = vadd.f32 %v1571_v56, %v1335_v57  ;;  %3177 = vmatmul.msk.f32.gmra.mxu2 %vm171_vm1, %v4576_v24  ;;  %v776_v56 = vadd.f32 %v775_v63, %v4578_v61 }
 0x1e7   : > { %3211 = vmatmul.msk.f32.gmra.mxu3 %vm171_vm1, %v2187_v34 }
 0x1e8   : > { %3144 = vmatmul.msk.f32.gmra.mxu1 %vm171_vm1, %v4572_v32 }
 0x1e9   : > { %v1018_v49 = vpop.f32.mrf.mxu2 }
 0x1ea   : > { %v1058_v31 = vadd.f32 %v1018_v49, %v773_v28  ;;  %v1296_v6 = vpop.f32.mrf.mxu3  ;;  %v1577_v27 = vpop.f32.mrf.mxu0 }
 0x1ec   : > { %v1336_v9 = vadd.f32 %v1296_v6, %v1058_v31 }
 0x1ed   : > { %v778_v18 = vpop.f32.mrf.mxu1  ;;  %3246 = vmatmul.msk.f32.gmra.mxu0 %vm171_vm1, %v3913_v33 }
 0x1ee   : > { %v4231_v0 = vadd.f32 %v1574_v44, %v1336_v9  ;;  %3178 = vmatmul.msk.f32.gmra.mxu2 %vm171_vm1, %v3886_v38  ;;  %v4579_v38 = vld [vmem:[#allocation26_spill] sm:$0xff]  ;;  %v2191_v9 = vld [vmem:[#allocation2 + $0xf1] sm:$0xff] }
 0x1ef   : > { %3212 = vmatmul.msk.f32.gmra.mxu3 %vm171_vm1, %v2188_v5  ;;  %v779_v60 = vadd.f32 %v778_v18, %v4579_v38 }
 0x1f0   : > { %3145 = vmatmul.msk.f32.gmra.mxu1 %vm171_vm1, %v4575_v1  ;;  %v2190_v1 = vld [vmem:[#allocation2 + $0xe1] sm:$0xff] }
 0x1f1   : > { %v1021_v41 = vpop.f32.mrf.mxu2 }
 0x1f2   : > { %v1059_v53 = vadd.f32 %v1021_v41, %v776_v56  ;;  %v1299_v19 = vpop.f32.mrf.mxu3  ;;  %v1580_v32 = vpop.f32.mrf.mxu0 }
 0x1f4   : > { %v1337_v14 = vadd.f32 %v1299_v19, %v1059_v53 }
 0x1f5   : > { %v781_v55 = vpop.f32.mrf.mxu1  ;;  %3247 = vmatmul.msk.f32.gmra.mxu0 %vm171_vm1, %v3928_v26 }
 0x1f6   : > { %v4241_v30 = vadd.f32 %v1577_v27, %v1337_v14  ;;  %3179 = vmatmul.msk.f32.gmra.mxu2 %vm171_vm1, %v3902_v47  ;;  %v4580_v47 = vld [vmem:[#allocation29_spill] sm:$0xff] }
 0x1f7   : > { %3213 = vmatmul.msk.f32.gmra.mxu3 %vm171_vm1, %v2189_v37  ;;  %v782_v28 = vadd.f32 %v781_v55, %v4580_v47  ;;  %v2192_v14 = vld [vmem:[#allocation2 + $0xf9] sm:$0xff] }
 0x1f8   : > { %3146 = vmatmul.msk.f32.gmra.mxu1 %vm171_vm1, %v3913_v33  ;;  %v4583_v47 = vld [vmem:[#allocation33_spill] sm:$0xff] }
 0x1f9   : > { %v1024_v21 = vpop.f32.mrf.mxu2 }
 0x1fa   : > { %v1060_v44 = vadd.f32 %v1024_v21, %v779_v60  ;;  %v1302_v57 = vpop.f32.mrf.mxu3  ;;  %v1583_v34 = vpop.f32.mrf.mxu0 }
 0x1fc   : > { %v1338_v63 = vadd.f32 %v1302_v57, %v1060_v44 }
 0x1fd   : > { %v1768_v24 = vpop.f32.mrf.mxu1  ;;  %3248 = vmatmul.msk.f32.gmra.mxu0 %vm171_vm1, %v3943_v59 }
 0x1fe   : > { %v4251_v52 = vadd.f32 %v1580_v32, %v1338_v63  ;;  %3180 = vmatmul.msk.f32.gmra.mxu2 %vm171_vm1, %v3915_v17  ;;  %v4581_v17 = vld [vmem:[#allocation31_spill] sm:$0xff]  ;;  %v4272_v32 = vld [vmem:[%s4487_s2] ss:$0 sm:$0xff] }
 0x1ff   : > { %3214 = vmatmul.msk.f32.gmra.mxu3 %vm171_vm1, %v2190_v1  ;;  %v1864_v61 = vadd.f32 %v1768_v24, %v4581_v17  ;;  %v2193_v1 = vld [vmem:[#allocation2 + $0x109] sm:$0xff] }
 0x200   : > { %3147 = vmatmul.msk.f32.gmra.mxu1 %vm171_vm1, %v3928_v26 }
 0x201   : > { %v1027_v33 = vpop.f32.mrf.mxu2 }
 0x202   : > { %v1061_v49 = vadd.f32 %v1027_v33, %v782_v28  ;;  %v1305_v31 = vpop.f32.mrf.mxu3  ;;  %v2603_v6 = vpop.f32.mrf.mxu0 }
 0x204   : > { %v1339_v27 = vadd.f32 %v1305_v31, %v1061_v49 }
 0x205   : > { %v1771_v5 = vpop.f32.mrf.mxu1  ;;  %3249 = vmatmul.msk.f32.gmra.mxu0 %vm171_vm1, %v3958_v39 }
 0x206   : > { %v4261_v18 = vadd.f32 %v1583_v34, %v1339_v27  ;;  %3181 = vmatmul.msk.f32.gmra.mxu2 %vm171_vm1, %v3930_v42 }
 0x207   : > { %3215 = vmatmul.msk.f32.gmra.mxu3 %vm171_vm1, %v2191_v9 }
 0x208   : > { %3148 = vmatmul.msk.f32.gmra.mxu1 %vm171_vm1, %v3943_v59  ;;  %v4582_v59 = vld [vmem:[#allocation32_spill] sm:$0xff] }
 0x209   : > { %v2047_v26 = vpop.f32.mrf.mxu2  ;;  %v1865_v55 = vadd.f32 %v1771_v5, %v4582_v59 }
 0x20a   : > { %v2143_v56 = vadd.f32 %v2047_v26, %v1864_v61  ;;  %v2325_v41 = vpop.f32.mrf.mxu3  ;;  %v2606_v53 = vpop.f32.mrf.mxu0  ;;  %v2194_v61 = vld [vmem:[#allocation2 + $0x111] sm:$0xff] }
 0x20c   : > { %v2421_v19 = vadd.f32 %v2325_v41, %v2143_v56 }
 0x20d   : > { %v1774_v42 = vpop.f32.mrf.mxu1  ;;  %3250 = vmatmul.msk.f32.gmra.mxu0 %vm171_vm1, %v3973_v10 }
 0x20e   : > { %v2699_v37 = vadd.f32 %v2603_v6, %v2421_v19  ;;  %3182 = vmatmul.msk.f32.gmra.mxu2 %vm171_vm1, %v3945_v16  ;;  %v1866_v28 = vadd.f32 %v1774_v42, %v4583_v47  ;;  %v1640_v47 = vld [vmem:[#allocation2 + $0x122] sm:$0xff] }
 0x20f   : > { %3216 = vmatmul.msk.f32.gmra.mxu3 %vm171_vm1, %v2192_v14 }
 0x210   : > { %v2735_v38 = vadd.f32 %v4272_v32, %v2699_v37  ;;  %3149 = vmatmul.msk.f32.gmra.mxu1 %vm171_vm1, %v3958_v39 }
 0x211   : > { %v2050_v60 = vpop.f32.mrf.mxu2 }
 0x212   : > { %vm2767_vm3 = vcmp.ge.f32.partialorder %v2735_v38, 0.0  ;;  %v2799_v21 = vmul.f32 0.2, %v2735_v38  ;;  %v2144_v16 = vadd.f32 %v2050_v60, %v1865_v55  ;;  %v2328_v44 = vpop.f32.mrf.mxu3  ;;  %v2609_v57 = vpop.f32.mrf.mxu0 }
 0x214   : > { %v2831_v34 = vsel %vm2767_vm3, %v2735_v38, %v2799_v21  ;;  %v2422_v63 = vadd.f32 %v2328_v44, %v2144_v16  ;;  %v2195_v38 = vld [vmem:[#allocation2 + $0x121] sm:$0xff] }
 0x215   : > { %2864 = vst.msk [vmem:[%s4288_s15] sm:$0xff] %vm2863_vm4, %v2831_v34  ;;  %v1777_v39 = vpop.f32.mrf.mxu1  ;;  %3251 = vmatmul.msk.f32.gmra.mxu0 %vm171_vm1, %v3988_v35 }
 0x216   : > { %v2700_v24 = vadd.f32 %v2606_v53, %v2422_v63  ;;  %3183 = vmatmul.msk.f32.gmra.mxu2 %vm171_vm1, %v3960_v12 }
 0x217   : > { %3217 = vmatmul.msk.f32.gmra.mxu3 %vm171_vm1, %v2193_v1 }
 0x218   : > { %v2736_v33 = vadd.f32 %v4272_v32, %v2700_v24  ;;  %3150 = vmatmul.msk.f32.gmra.mxu1 %vm171_vm1, %v3973_v10  ;;  %v4584_v10 = vld [vmem:[#allocation34_spill] sm:$0xff] }
 0x219   : > { %v2053_v49 = vpop.f32.mrf.mxu2  ;;  %v1867_v56 = vadd.f32 %v1777_v39, %v4584_v10  ;;  %v2196_v24 = vld [vmem:[#allocation2 + $0x129] sm:$0xff] }
 0x21a   : > { %vm2768_vm5 = vcmp.ge.f32.partialorder %v2736_v33, 0.0  ;;  %v2800_v31 = vmul.f32 0.2, %v2736_v33  ;;  %v2145_v6 = vadd.f32 %v2053_v49, %v1866_v28  ;;  %v2331_v27 = vpop.f32.mrf.mxu3  ;;  %v2612_v9 = vpop.f32.mrf.mxu0 }
 0x21c   : > { %v2832_v5 = vsel %vm2768_vm5, %v2736_v33, %v2800_v31  ;;  %v2423_v17 = vadd.f32 %v2331_v27, %v2145_v6  ;;  %v4586_v33 = vld [vmem:[#allocation37_spill] sm:$0xff] }
 0x21d   : > { %2865 = vst.msk [vmem:[%s4288_s15 + $0x8] sm:$0xff] %vm2863_vm4, %v2832_v5  ;;  %v1780_v12 = vpop.f32.mrf.mxu1  ;;  %3252 = vmatmul.msk.f32.gmra.mxu0 %vm171_vm1, %v4003_v15 }
 0x21e   : > { %v2701_v26 = vadd.f32 %v2609_v57, %v2423_v17  ;;  %3184 = vmatmul.msk.f32.gmra.mxu2 %vm171_vm1, %v3975_v43 }
 0x21f   : > { %3218 = vmatmul.msk.f32.gmra.mxu3 %vm171_vm1, %v2194_v61 }
 0x220   : > { %v2737_v41 = vadd.f32 %v4272_v32, %v2701_v26  ;;  %3151 = vmatmul.msk.f32.gmra.mxu1 %vm171_vm1, %v3988_v35  ;;  %v4585_v35 = vld [vmem:[#allocation35_spill] sm:$0xff]  ;;  %v2197_v26 = vld [vmem:[#allocation2 + $0x139] sm:$0xff] }
 0x221   : > { %v2056_v53 = vpop.f32.mrf.mxu2  ;;  %v1868_v21 = vadd.f32 %v1780_v12, %v4585_v35 }
 0x222   : > { %vm2769_vm6 = vcmp.ge.f32.partialorder %v2737_v41, 0.0  ;;  %v2801_v19 = vmul.f32 0.2, %v2737_v41  ;;  %v2146_v14 = vadd.f32 %v2056_v53, %v1867_v56  ;;  %v2334_v42 = vpop.f32.mrf.mxu3  ;;  %v2615_v37 = vpop.f32.mrf.mxu0  ;;  %v1641_v56 = vld [vmem:[#allocation2 + $0x12a] sm:$0xff] }
 0x223   : > { %v4588_v53 = vld [vmem:[#allocation38_spill] sm:$0xff] }
 0x224   : > { %v2833_v59 = vsel %vm2769_vm6, %v2737_v41, %v2801_v19  ;;  %v2424_v55 = vadd.f32 %v2334_v42, %v2146_v14 }
 0x225   : > { %2866 = vst.msk [vmem:[%s4288_s15 + $0x10] sm:$0xff] %vm2863_vm4, %v2833_v59  ;;  %v1783_v43 = vpop.f32.mrf.mxu1  ;;  %3253 = vmatmul.msk.f32.gmra.mxu0 %vm171_vm1, %v4018_v48 }
 0x226   : > { %v2702_v60 = vadd.f32 %v2612_v9, %v2424_v55  ;;  %3185 = vmatmul.msk.f32.gmra.mxu2 %vm171_vm1, %v3990_v3 }
 0x227   : > { %3219 = vmatmul.msk.f32.gmra.mxu3 %vm171_vm1, %v2195_v38 }
 0x228   : > { %v2738_v16 = vadd.f32 %v4272_v32, %v2702_v60  ;;  %3152 = vmatmul.msk.f32.gmra.mxu1 %vm171_vm1, %v4003_v15  ;;  %v4587_v15 = vld [vmem:[#allocation36_spill] sm:$0xff] }
 0x229   : > { %v2059_v44 = vpop.f32.mrf.mxu2  ;;  %v1869_v49 = vadd.f32 %v1783_v43, %v4587_v15  ;;  %v2476_v43 = vld [vmem:[#allocation2 + $0x142] sm:$0xff] }
 0x22a   : > { %vm2770_vm7 = vcmp.ge.f32.partialorder %v2738_v16, 0.0  ;;  %v2802_v57 = vmul.f32 0.2, %v2738_v16  ;;  %v2147_v34 = vadd.f32 %v2059_v44, %v1868_v21  ;;  %v2337_v63 = vpop.f32.mrf.mxu3  ;;  %v2618_v48 = vpop.f32.mrf.mxu0  ;;  %v2198_v21 = vld [vmem:[#allocation2 + $0x141] sm:$0xff] }
 0x22b   : > { %v1642_v44 = vld [vmem:[#allocation2 + $0x13a] sm:$0xff] }
 0x22c   : > { %v2834_v1 = vsel %vm2770_vm7, %v2738_v16, %v2802_v57  ;;  %v2425_v39 = vadd.f32 %v2337_v63, %v2147_v34  ;;  %v4589_v34 = vld [vmem:[#allocation39_spill] sm:$0xff] }
 0x22d   : > { %2867 = vst.msk [vmem:[%s4288_s15 + $0x18] sm:$0xff] %vm2863_vm4, %v2834_v1  ;;  %v1786_v3 = vpop.f32.mrf.mxu1  ;;  %3254 = vmatmul.msk.f32.gmra.mxu0 %vm171_vm1, %v4030_v54  ;;  %v1919_v54 = vld [vmem:[#allocation2 + $0x138] sm:$0xff] }
 0x22e   : > { %v2703_v28 = vadd.f32 %v2615_v37, %v2425_v39  ;;  %3186 = vmatmul.msk.f32.gmra.mxu2 %vm171_vm1, %v4586_v33  ;;  %v1870_v19 = vadd.f32 %v1786_v3, %v4588_v53  ;;  %v1921_v33 = vld [vmem:[#allocation2 + $0x150] sm:$0xff] }
 0x22f   : > { %3220 = vmatmul.msk.f32.gmra.mxu3 %vm171_vm1, %v2196_v24 }
 0x230   : > { %v2739_v31 = vadd.f32 %v4272_v32, %v2703_v28  ;;  %3153 = vmatmul.msk.f32.gmra.mxu1 %vm171_vm1, %v1640_v47  ;;  %v2477_v28 = vld [vmem:[#allocation2 + $0x152] sm:$0xff] }
 0x231   : > { %v2062_v6 = vpop.f32.mrf.mxu2 }
 0x232   : > { %vm2771_vm8 = vcmp.ge.f32.partialorder %v2739_v31, 0.0  ;;  %v2803_v27 = vmul.f32 0.2, %v2739_v31  ;;  %v2148_v9 = vadd.f32 %v2062_v6, %v1869_v49  ;;  %v2340_v5 = vpop.f32.mrf.mxu3  ;;  %v2621_v17 = vpop.f32.mrf.mxu0 }
 0x234   : > { %v2835_v61 = vsel %vm2771_vm8, %v2739_v31, %v2803_v27  ;;  %v2426_v12 = vadd.f32 %v2340_v5, %v2148_v9  ;;  %v2199_v31 = vld [vmem:[#allocation2 + $0x151] sm:$0xff] }
 0x235   : > { %2868 = vst.msk [vmem:[%s4288_s15 + $0x20] sm:$0xff] %vm2863_vm4, %v2835_v61  ;;  %v1789_v10 = vpop.f32.mrf.mxu1  ;;  %3255 = vmatmul.msk.f32.gmra.mxu0 %vm171_vm1, %v4043_v50  ;;  %v1920_v50 = vld [vmem:[#allocation2 + $0x140] sm:$0xff]  ;;  %v4590_v9 = vld [vmem:[#allocation40_spill] sm:$0xff] }
 0x236   : > { %v2704_v41 = vadd.f32 %v2618_v48, %v2426_v12  ;;  %3187 = vmatmul.msk.f32.gmra.mxu2 %vm171_vm1, %v1919_v54  ;;  %v1871_v63 = vadd.f32 %v1789_v10, %v4589_v34 }
 0x237   : > { %3221 = vmatmul.msk.f32.gmra.mxu3 %vm171_vm1, %v2197_v26 }
 0x238   : > { %v2740_v14 = vadd.f32 %v4272_v32, %v2704_v41  ;;  %3154 = vmatmul.msk.f32.gmra.mxu1 %vm171_vm1, %v1641_v56  ;;  %v2478_v56 = vld [vmem:[#allocation2 + $0x15a] sm:$0xff] }
 0x239   : > { %v2065_v42 = vpop.f32.mrf.mxu2  ;;  %v1922_v41 = vld [vmem:[#allocation2 + $0x158] sm:$0xff] }
 0x23a   : > { %vm2772_vm9 = vcmp.ge.f32.partialorder %v2740_v14, 0.0  ;;  %v2804_v37 = vmul.f32 0.2, %v2740_v14  ;;  %v2149_v59 = vadd.f32 %v2065_v42, %v1870_v19  ;;  %v2343_v55 = vpop.f32.mrf.mxu3  ;;  %v2624_v38 = vpop.f32.mrf.mxu0 }
 0x23c   : > { %v2836_v60 = vsel %vm2772_vm9, %v2740_v14, %v2804_v37  ;;  %v2427_v35 = vadd.f32 %v2343_v55, %v2149_v59  ;;  %v2200_v14 = vld [vmem:[#allocation2 + $0x159] sm:$0xff] }
 0x23d   : > { %2869 = vst.msk [vmem:[%s4288_s15 + $0x28] sm:$0xff] %vm2863_vm4, %v2836_v60  ;;  %v1792_v16 = vpop.f32.mrf.mxu1  ;;  %3256 = vmatmul.msk.f32.gmra.mxu0 %vm171_vm1, %v2476_v43  ;;  %v4591_v59 = vld [vmem:[#allocation41_spill] sm:$0xff] }
 0x23e   : > { %v2705_v57 = vadd.f32 %v2621_v17, %v2427_v35  ;;  %3188 = vmatmul.msk.f32.gmra.mxu2 %vm171_vm1, %v1920_v50  ;;  %v1872_v5 = vadd.f32 %v1792_v16, %v4590_v9  ;;  %v2479_v16 = vld [vmem:[#allocation2 + $0x16a] sm:$0xff] }
 0x23f   : > { %3222 = vmatmul.msk.f32.gmra.mxu3 %vm171_vm1, %v2198_v21  ;;  %v2202_v9 = vld [vmem:[#allocation2 + $0x171] sm:$0xff] }
 0x240   : > { %v2741_v48 = vadd.f32 %v4272_v32, %v2705_v57  ;;  %3155 = vmatmul.msk.f32.gmra.mxu1 %vm171_vm1, %v1642_v44  ;;  %v1923_v44 = vld [vmem:[#allocation2 + $0x168] sm:$0xff] }
 0x241   : > { %v2068_v1 = vpop.f32.mrf.mxu2 }
 0x242   : > { %vm2773_vm10 = vcmp.ge.f32.partialorder %v2741_v48, 0.0  ;;  %v2805_v39 = vmul.f32 0.2, %v2741_v48  ;;  %v2150_v24 = vadd.f32 %v2068_v1, %v1871_v63  ;;  %v2346_v3 = vpop.f32.mrf.mxu3  ;;  %v2627_v47 = vpop.f32.mrf.mxu0  ;;  %v2201_v63 = vld [vmem:[#allocation2 + $0x169] sm:$0xff] }
 0x244   : > { %v2837_v15 = vsel %vm2773_vm10, %v2741_v48, %v2805_v39  ;;  %v2428_v49 = vadd.f32 %v2346_v3, %v2150_v24 }
 0x245   : > { %2870 = vst.msk [vmem:[%s4288_s15 + $0x30] sm:$0xff] %vm2863_vm4, %v2837_v15  ;;  %v1795_v6 = vpop.f32.mrf.mxu1  ;;  %3257 = vmatmul.msk.f32.gmra.mxu0 %vm171_vm1, %v2477_v28 }
 0x246   : > { %v2706_v27 = vadd.f32 %v2624_v38, %v2428_v49  ;;  %3189 = vmatmul.msk.f32.gmra.mxu2 %vm171_vm1, %v1921_v33  ;;  %v1873_v55 = vadd.f32 %v1795_v6, %v4591_v59  ;;  %v2480_v49 = vld [vmem:[#allocation2 + $0x172] sm:$0xff] }
 0x247   : > { %3223 = vmatmul.msk.f32.gmra.mxu3 %vm171_vm1, %v2199_v31  ;;  %v1924_v31 = vld [vmem:[#allocation2 + $0x170] sm:$0xff] }
 0x248   : > { %v2742_v17 = vadd.f32 %v4272_v32, %v2706_v27  ;;  %3156 = vmatmul.msk.f32.gmra.mxu1 %vm171_vm1, %v2476_v43 }
 0x249   : > { %v2071_v54 = vpop.f32.mrf.mxu2 }
 0x24a   : > { %vm2774_vm11 = vcmp.ge.f32.partialorder %v2742_v17, 0.0  ;;  %v2806_v61 = vmul.f32 0.2, %v2742_v17  ;;  %v2151_v12 = vadd.f32 %v2071_v54, %v1872_v5  ;;  %v2349_v26 = vpop.f32.mrf.mxu3  ;;  %v2630_v10 = vpop.f32.mrf.mxu0 }
 0x24c   : > { %v2838_v53 = vsel %vm2774_vm11, %v2742_v17, %v2806_v61  ;;  %v2429_v19 = vadd.f32 %v2349_v26, %v2151_v12 }
 0x24d   : > { %2871 = vst.msk [vmem:[%s4288_s15 + $0x38] sm:$0xff] %vm2863_vm4, %v2838_v53  ;;  %v1798_v42 = vpop.f32.mrf.mxu1  ;;  %3258 = vmatmul.msk.f32.gmra.mxu0 %vm171_vm1, %v2478_v56  ;;  %v1925_v53 = vld [vmem:[#allocation2 + $0x180] sm:$0xff] }
 0x24e   : > { %v2707_v37 = vadd.f32 %v2627_v47, %v2429_v19  ;;  %3190 = vmatmul.msk.f32.gmra.mxu2 %vm171_vm1, %v1922_v41  ;;  %v1874_v39 = vadd.f32 %v1798_v42, %v4058_v11  ;;  %v2481_v41 = vld [vmem:[#allocation2 + $0x182] sm:$0xff] }
 0x24f   : > { %3224 = vmatmul.msk.f32.gmra.mxu3 %vm171_vm1, %v2200_v14  ;;  %v2203_v42 = vld [vmem:[#allocation2 + $0x181] sm:$0xff] }
 0x250   : > { %v2743_v38 = vadd.f32 %v4272_v32, %v2707_v37  ;;  %3157 = vmatmul.msk.f32.gmra.mxu1 %vm171_vm1, %v2477_v28 }
 0x251   : > { %v2074_v43 = vpop.f32.mrf.mxu2 }
 0x252   : > { %vm2775_vm12 = vcmp.ge.f32.partialorder %v2743_v38, 0.0  ;;  %v2807_v50 = vmul.f32 0.2, %v2743_v38  ;;  %v2152_v60 = vadd.f32 %v2074_v43, %v1873_v55  ;;  %v2352_v35 = vpop.f32.mrf.mxu3  ;;  %v2633_v21 = vpop.f32.mrf.mxu0 }
 0x254   : > { %v2839_v57 = vsel %vm2775_vm12, %v2743_v38, %v2807_v50  ;;  %v2430_v34 = vadd.f32 %v2352_v35, %v2152_v60 }
 0x255   : > { %2872 = vst.msk [vmem:[%s4288_s15 + $0x40] sm:$0xff] %vm2863_vm4, %v2839_v57  ;;  %v1801_v48 = vpop.f32.mrf.mxu1  ;;  %3259 = vmatmul.msk.f32.gmra.mxu0 %vm171_vm1, %v2479_v16 }
 0x256   : > { %v2708_v1 = vadd.f32 %v2630_v10, %v2430_v34  ;;  %3191 = vmatmul.msk.f32.gmra.mxu2 %vm171_vm1, %v1923_v44  ;;  %v1875_v17 = vadd.f32 %v1801_v48, %v4066_v62  ;;  %v2204_v34 = vld [vmem:[#allocation2 + $0x189] sm:$0xff] }
 0x257   : > { %3225 = vmatmul.msk.f32.gmra.mxu3 %vm171_vm1, %v2201_v63 }
 0x258   : > { %v2744_v24 = vadd.f32 %v4272_v32, %v2708_v1  ;;  %3158 = vmatmul.msk.f32.gmra.mxu1 %vm171_vm1, %v2478_v56 }
 0x259   : > { %v2077_v3 = vpop.f32.mrf.mxu2 }
 0x25a   : > { %vm2776_vm13 = vcmp.ge.f32.partialorder %v2744_v24, 0.0  ;;  %v2808_v47 = vmul.f32 0.2, %v2744_v24  ;;  %v2153_v28 = vadd.f32 %v2077_v3, %v1874_v39  ;;  %v2355_v33 = vpop.f32.mrf.mxu3  ;;  %v2636_v15 = vpop.f32.mrf.mxu0 }
 0x25c   : > { %v2840_v6 = vsel %vm2776_vm13, %v2744_v24, %v2808_v47  ;;  %v2431_v27 = vadd.f32 %v2355_v33, %v2153_v28  ;;  %v2483_v33 = vld [vmem:[#allocation2 + $0x19a] sm:$0xff] }
 0x25d   : > { %2873 = vst.msk [vmem:[%s4288_s15 + $0x48] sm:$0xff] %vm2863_vm4, %v2840_v6  ;;  %v1804_v5 = vpop.f32.mrf.mxu1  ;;  %3260 = vmatmul.msk.f32.gmra.mxu0 %vm171_vm1, %v2480_v49  ;;  %v2205_v6 = vld [vmem:[#allocation2 + $0x199] sm:$0xff] }
 0x25e   : > { %v2709_v11 = vadd.f32 %v2633_v21, %v2431_v27  ;;  %3192 = vmatmul.msk.f32.gmra.mxu2 %vm171_vm1, %v1924_v31  ;;  %v1876_v59 = vadd.f32 %v1804_v5, %v4074_v4  ;;  %v2482_v21 = vld [vmem:[#allocation2 + $0x18a] sm:$0xff] }
 0x25f   : > { %3226 = vmatmul.msk.f32.gmra.mxu3 %vm171_vm1, %v2202_v9 }
 0x260   : > { %v2745_v54 = vadd.f32 %v4272_v32, %v2709_v11  ;;  %3159 = vmatmul.msk.f32.gmra.mxu1 %vm171_vm1, %v2479_v16  ;;  %v1926_v16 = vld [vmem:[#allocation2 + $0x188] sm:$0xff] }
 0x261   : > { %v2080_v61 = vpop.f32.mrf.mxu2 }
 0x262   : > { %vm2777_vm14 = vcmp.ge.f32.partialorder %v2745_v54, 0.0  ;;  %v2809_v12 = vmul.f32 0.2, %v2745_v54  ;;  %v2154_v26 = vadd.f32 %v2080_v61, %v1875_v17  ;;  %v2358_v10 = vpop.f32.mrf.mxu3  ;;  %v2639_v56 = vpop.f32.mrf.mxu0 }
 0x264   : > { %v2841_v19 = vsel %vm2777_vm14, %v2745_v54, %v2809_v12  ;;  %v2432_v14 = vadd.f32 %v2358_v10, %v2154_v26  ;;  %v2484_v26 = vld [vmem:[#allocation2 + $0x1a2] sm:$0xff] }
 0x265   : > { %2874 = vst.msk [vmem:[%s4288_s15 + $0x50] sm:$0xff] %vm2863_vm4, %v2841_v19  ;;  %v1807_v37 = vpop.f32.mrf.mxu1  ;;  %3261 = vmatmul.msk.f32.gmra.mxu0 %vm171_vm1, %v2481_v41  ;;  %v1928_v10 = vld [vmem:[#allocation2 + $0x1a0] sm:$0xff] }
 0x266   : > { %v2710_v62 = vadd.f32 %v2636_v15, %v2432_v14  ;;  %3193 = vmatmul.msk.f32.gmra.mxu2 %vm171_vm1, %v1925_v53  ;;  %v1877_v48 = vadd.f32 %v1807_v37, %v4081_v8  ;;  %v1927_v15 = vld [vmem:[#allocation2 + $0x198] sm:$0xff]  ;;  %v2206_v53 = vld [vmem:[#allocation2 + $0x1a1] sm:$0xff] }
 0x267   : > { %3227 = vmatmul.msk.f32.gmra.mxu3 %vm171_vm1, %v2203_v42 }
 0x268   : > { %v2746_v55 = vadd.f32 %v4272_v32, %v2710_v62  ;;  %3160 = vmatmul.msk.f32.gmra.mxu1 %vm171_vm1, %v2480_v49 }
 0x269   : > { %v2083_v38 = vpop.f32.mrf.mxu2 }
 0x26a   : > { %vm2778_vm15 = vcmp.ge.f32.partialorder %v2746_v55, 0.0  ;;  %v2810_v43 = vmul.f32 0.2, %v2746_v55  ;;  %v2155_v50 = vadd.f32 %v2083_v38, %v1876_v59  ;;  %v2361_v60 = vpop.f32.mrf.mxu3  ;;  %v2642_v35 = vpop.f32.mrf.mxu0 }
 0x26c   : > { %v2842_v44 = vsel %vm2778_vm15, %v2746_v55, %v2810_v43  ;;  %v2433_v57 = vadd.f32 %v2361_v60, %v2155_v50 }
 0x26d   : > { %2875 = vst.msk [vmem:[%s4288_s15 + $0x58] sm:$0xff] %vm2863_vm4, %v2842_v44  ;;  %v1810_v63 = vpop.f32.mrf.mxu1  ;;  %3262 = vmatmul.msk.f32.gmra.mxu0 %vm171_vm1, %v2482_v21 }
 0x26e   : > { %v2711_v4 = vadd.f32 %v2639_v56, %v2433_v57  ;;  %3194 = vmatmul.msk.f32.gmra.mxu2 %vm171_vm1, %v1926_v16  ;;  %v1878_v9 = vadd.f32 %v1810_v63, %v4088_v2 }
 0x26f   : > { %3228 = vmatmul.msk.f32.gmra.mxu3 %vm171_vm1, %v2204_v34 }
 0x270   : > { %v2747_v1 = vadd.f32 %v4272_v32, %v2711_v4  ;;  %3161 = vmatmul.msk.f32.gmra.mxu1 %vm171_vm1, %v2481_v41 }
 0x271   : > { %v2086_v39 = vpop.f32.mrf.mxu2 }
 0x272   : > { %vm2779_vm0 = vcmp.ge.f32.partialorder %v2747_v1, 0.0  ;;  %v2811_v24 = vmul.f32 0.2, %v2747_v1  ;;  %v2156_v3 = vadd.f32 %v2086_v39, %v1877_v48  ;;  %v2364_v47 = vpop.f32.mrf.mxu3  ;;  %v2645_v28 = vpop.f32.mrf.mxu0 }
 0x274   : > { %v2843_v49 = vsel %vm2779_vm0, %v2747_v1, %v2811_v24  ;;  %v2434_v31 = vadd.f32 %v2364_v47, %v2156_v3 }
 0x275   : > { %2876 = vst.msk [vmem:[%s4288_s15 + $0x60] sm:$0xff] %vm2863_vm4, %v2843_v49  ;;  %v1813_v27 = vpop.f32.mrf.mxu1  ;;  %3263 = vmatmul.msk.f32.gmra.mxu0 %vm171_vm1, %v2483_v33 }
 0x276   : > { %v2712_v8 = vadd.f32 %v2642_v35, %v2434_v31  ;;  %3195 = vmatmul.msk.f32.gmra.mxu2 %vm171_vm1, %v1927_v15  ;;  %v1879_v14 = vadd.f32 %v1813_v27, %v4097_v36 }
 0x277   : > { %3229 = vmatmul.msk.f32.gmra.mxu3 %vm171_vm1, %v2205_v6 }
 0x278   : > { %v2748_v5 = vadd.f32 %v4272_v32, %v2712_v8  ;;  %3162 = vmatmul.msk.f32.gmra.mxu1 %vm171_vm1, %v2482_v21 }
 0x279   : > { %v2089_v11 = vpop.f32.mrf.mxu2 }
 0x27a   : > { %vm2780_vm2 = vcmp.ge.f32.partialorder %v2748_v5, 0.0  ;;  %v2812_v17 = vmul.f32 0.2, %v2748_v5  ;;  %v2157_v54 = vadd.f32 %v2089_v11, %v1878_v9  ;;  %v2367_v61 = vpop.f32.mrf.mxu3  ;;  %v2648_v12 = vpop.f32.mrf.mxu0 }
 0x27c   : > { %v2844_v56 = vsel %vm2780_vm2, %v2748_v5, %v2812_v17  ;;  %v2435_v41 = vadd.f32 %v2367_v61, %v2157_v54 }
 0x27d   : > { %2877 = vst.msk [vmem:[%s4288_s15 + $0x68] sm:$0xff] %vm2863_vm4, %v2844_v56  ;;  %v1816_v19 = vpop.f32.mrf.mxu1  ;;  %3264 = vmatmul.msk.f32.gmra.mxu0 %vm171_vm1, %v2484_v26 }
 0x27e   : > { %v2713_v2 = vadd.f32 %v2645_v28, %v2435_v41  ;;  %3196 = vmatmul.msk.f32.gmra.mxu2 %vm171_vm1, %v1928_v10  ;;  %v1880_v21 = vadd.f32 %v1816_v19, %v4108_v7 }
 0x27f   : > { %3230 = vmatmul.msk.f32.gmra.mxu3 %vm171_vm1, %v2206_v53 }
 0x280   : > { %v2749_v42 = vadd.f32 %v4272_v32, %v2713_v2 }
 0x281   : > { %v2092_v37 = vpop.f32.mrf.mxu2 }
 0x282   : > { %vm2781_vm3 = vcmp.ge.f32.partialorder %v2749_v42, 0.0  ;;  %v2813_v62 = vmul.f32 0.2, %v2749_v42  ;;  %v2158_v59 = vadd.f32 %v2092_v37, %v1879_v14  ;;  %v2370_v55 = vpop.f32.mrf.mxu3  ;;  %v2651_v38 = vpop.f32.mrf.mxu0 }
 0x284   : > { %v2845_v43 = vsel %vm2781_vm3, %v2749_v42, %v2813_v62  ;;  %v2436_v50 = vadd.f32 %v2370_v55, %v2158_v59 }
 0x285   : > { %2878 = vst.msk [vmem:[%s4288_s15 + $0x70] sm:$0xff] %vm2863_vm4, %v2845_v43  ;;  %v1819_v60 = vpop.f32.mrf.mxu1 }
 0x286   : > { %v2714_v35 = vadd.f32 %v2648_v12, %v2436_v50  ;;  %v1881_v24 = vadd.f32 %v1819_v60, %v4119_v51 }
 0x288   : > { %v2750_v16 = vadd.f32 %v4272_v32, %v2714_v35 }
 0x289   : > { %v2095_v36 = vpop.f32.mrf.mxu2 }
 0x28a   : > { %vm2782_vm1 = vcmp.ge.f32.partialorder %v2750_v16, 0.0  ;;  %v2814_v44 = vmul.f32 0.2, %v2750_v16  ;;  %v2159_v57 = vadd.f32 %v2095_v36, %v1880_v21  ;;  %v2373_v34 = vpop.f32.mrf.mxu3  ;;  %v2654_v63 = vpop.f32.mrf.mxu0 }
 0x28c   : > { %v2846_v4 = vsel %vm2782_vm1, %v2750_v16, %v2814_v44  ;;  %v2437_v48 = vadd.f32 %v2373_v34, %v2159_v57 }
 0x28d   : > { %2879 = vst.msk [vmem:[%s4288_s15 + $0x78] sm:$0xff] %vm2863_vm4, %v2846_v4  ;;  %v1822_v1 = vpop.f32.mrf.mxu1 }
 0x28e   : > { %v2715_v39 = vadd.f32 %v2651_v38, %v2437_v48  ;;  %v1882_v8 = vadd.f32 %v1822_v1, %v4130_v58 }
 0x290   : > { %v2751_v3 = vadd.f32 %v4272_v32, %v2715_v39 }
 0x291   : > { %v2098_v7 = vpop.f32.mrf.mxu2 }
 0x292   : > { %vm2783_vm5 = vcmp.ge.f32.partialorder %v2751_v3, 0.0  ;;  %v2815_v47 = vmul.f32 0.2, %v2751_v3  ;;  %v2160_v28 = vadd.f32 %v2098_v7, %v1881_v24  ;;  %v2376_v33 = vpop.f32.mrf.mxu3  ;;  %v2657_v15 = vpop.f32.mrf.mxu0 }
 0x294   : > { %v2847_v49 = vsel %vm2783_vm5, %v2751_v3, %v2815_v47  ;;  %v2438_v31 = vadd.f32 %v2376_v33, %v2160_v28 }
 0x295   : > { %2880 = vst.msk [vmem:[%s4288_s15 + $0x80] sm:$0xff] %vm2863_vm4, %v2847_v49  ;;  %v1825_v6 = vpop.f32.mrf.mxu1 }
 0x296   : > { %v2716_v27 = vadd.f32 %v2654_v63, %v2438_v31  ;;  %v1883_v56 = vadd.f32 %v1825_v6, %v4141_v40 }
 0x298   : > { %v2752_v9 = vadd.f32 %v4272_v32, %v2716_v27 }
 0x299   : > { %v2101_v51 = vpop.f32.mrf.mxu2 }
 0x29a   : > { %vm2784_vm6 = vcmp.ge.f32.partialorder %v2752_v9, 0.0  ;;  %v2816_v5 = vmul.f32 0.2, %v2752_v9  ;;  %v2161_v11 = vadd.f32 %v2101_v51, %v1882_v8  ;;  %v2379_v17 = vpop.f32.mrf.mxu3  ;;  %v2660_v54 = vpop.f32.mrf.mxu0 }
 0x29c   : > { %v2848_v61 = vsel %vm2784_vm6, %v2752_v9, %v2816_v5  ;;  %v2439_v12 = vadd.f32 %v2379_v17, %v2161_v11 }
 0x29d   : > { %2881 = vst.msk [vmem:[%s4288_s15 + $0x88] sm:$0xff] %vm2863_vm4, %v2848_v61  ;;  %v1828_v26 = vpop.f32.mrf.mxu1 }
 0x29e   : > { %v2717_v10 = vadd.f32 %v2657_v15, %v2439_v12  ;;  %v1884_v55 = vadd.f32 %v1828_v26, %v4151_v46 }
 0x2a0   : > { %v2753_v41 = vadd.f32 %v4272_v32, %v2717_v10 }
 0x2a1   : > { %v2104_v58 = vpop.f32.mrf.mxu2 }
 0x2a2   : > { %vm2785_vm7 = vcmp.ge.f32.partialorder %v2753_v41, 0.0  ;;  %v2817_v53 = vmul.f32 0.2, %v2753_v41  ;;  %v2162_v19 = vadd.f32 %v2104_v58, %v1883_v56  ;;  %v2382_v2 = vpop.f32.mrf.mxu3  ;;  %v2663_v14 = vpop.f32.mrf.mxu0 }
 0x2a4   : > { %v2849_v42 = vsel %vm2785_vm7, %v2753_v41, %v2817_v53  ;;  %v2440_v37 = vadd.f32 %v2382_v2, %v2162_v19 }
 0x2a5   : > { %2882 = vst.msk [vmem:[%s4288_s15 + $0x90] sm:$0xff] %vm2863_vm4, %v2849_v42  ;;  %v1831_v62 = vpop.f32.mrf.mxu1 }
 0x2a6   : > { %v2718_v59 = vadd.f32 %v2660_v54, %v2440_v37  ;;  %v1885_v57 = vadd.f32 %v1831_v62, %v4161_v22 }
 0x2a8   : > { %v2754_v38 = vadd.f32 %v4272_v32, %v2718_v59 }
 0x2a9   : > { %v2107_v40 = vpop.f32.mrf.mxu2 }
 0x2aa   : > { %vm2786_vm8 = vcmp.ge.f32.partialorder %v2754_v38, 0.0  ;;  %v2818_v43 = vmul.f32 0.2, %v2754_v38  ;;  %v2163_v50 = vadd.f32 %v2107_v40, %v1884_v55  ;;  %v2385_v60 = vpop.f32.mrf.mxu3  ;;  %v2666_v35 = vpop.f32.mrf.mxu0 }
 0x2ac   : > { %v2850_v21 = vsel %vm2786_vm8, %v2754_v38, %v2818_v43  ;;  %v2441_v16 = vadd.f32 %v2385_v60, %v2163_v50 }
 0x2ad   : > { %2883 = vst.msk [vmem:[%s4288_s15 + $0x98] sm:$0xff] %vm2863_vm4, %v2850_v21  ;;  %v1834_v36 = vpop.f32.mrf.mxu1 }
 0x2ae   : > { %v2719_v44 = vadd.f32 %v2663_v14, %v2441_v16  ;;  %v1886_v47 = vadd.f32 %v1834_v36, %v4171_v13 }
 0x2b0   : > { %v2755_v34 = vadd.f32 %v4272_v32, %v2719_v44 }
 0x2b1   : > { %v2110_v46 = vpop.f32.mrf.mxu2 }
 0x2b2   : > { %vm2787_vm9 = vcmp.ge.f32.partialorder %v2755_v34, 0.0  ;;  %v2819_v63 = vmul.f32 0.2, %v2755_v34  ;;  %v2164_v4 = vadd.f32 %v2110_v46, %v1885_v57  ;;  %v2388_v48 = vpop.f32.mrf.mxu3  ;;  %v2669_v1 = vpop.f32.mrf.mxu0 }
 0x2b4   : > { %v2851_v39 = vsel %vm2787_vm9, %v2755_v34, %v2819_v63  ;;  %v2442_v24 = vadd.f32 %v2388_v48, %v2164_v4 }
 0x2b5   : > { %2884 = vst.msk [vmem:[%s4288_s15 + $0xa0] sm:$0xff] %vm2863_vm4, %v2851_v39  ;;  %v1837_v3 = vpop.f32.mrf.mxu1 }
 0x2b6   : > { %v2720_v7 = vadd.f32 %v2666_v35, %v2442_v24  ;;  %v1887_v51 = vadd.f32 %v1837_v3, %v4181_v29 }
 0x2b8   : > { %v2756_v28 = vadd.f32 %v4272_v32, %v2720_v7 }
 0x2b9   : > { %v2113_v22 = vpop.f32.mrf.mxu2 }
 0x2ba   : > { %vm2788_vm10 = vcmp.ge.f32.partialorder %v2756_v28, 0.0  ;;  %v2820_v33 = vmul.f32 0.2, %v2756_v28  ;;  %v2165_v15 = vadd.f32 %v2113_v22, %v1886_v47  ;;  %v2391_v49 = vpop.f32.mrf.mxu3  ;;  %v2672_v31 = vpop.f32.mrf.mxu0 }
 0x2bc   : > { %v2852_v6 = vsel %vm2788_vm10, %v2756_v28, %v2820_v33  ;;  %v2443_v27 = vadd.f32 %v2391_v49, %v2165_v15 }
 0x2bd   : > { %2885 = vst.msk [vmem:[%s4288_s15 + $0xa8] sm:$0xff] %vm2863_vm4, %v2852_v6  ;;  %v1840_v8 = vpop.f32.mrf.mxu1 }
 0x2be   : > { %v2721_v9 = vadd.f32 %v2669_v1, %v2443_v27  ;;  %v1888_v41 = vadd.f32 %v1840_v8, %v4191_v45 }
 0x2c0   : > { %v2757_v5 = vadd.f32 %v4272_v32, %v2721_v9 }
 0x2c1   : > { %v2116_v13 = vpop.f32.mrf.mxu2 }
 0x2c2   : > { %vm2789_vm11 = vcmp.ge.f32.partialorder %v2757_v5, 0.0  ;;  %v2821_v11 = vmul.f32 0.2, %v2757_v5  ;;  %v2166_v17 = vadd.f32 %v2116_v13, %v1887_v51  ;;  %v2394_v54 = vpop.f32.mrf.mxu3  ;;  %v2675_v61 = vpop.f32.mrf.mxu0 }
 0x2c4   : > { %v2853_v12 = vsel %vm2789_vm11, %v2757_v5, %v2821_v11  ;;  %v2444_v26 = vadd.f32 %v2394_v54, %v2166_v17 }
 0x2c5   : > { %2886 = vst.msk [vmem:[%s4288_s15 + $0xb0] sm:$0xff] %vm2863_vm4, %v2853_v12  ;;  %v1843_v10 = vpop.f32.mrf.mxu1 }
 0x2c6   : > { %v2722_v56 = vadd.f32 %v2672_v31, %v2444_v26  ;;  %v1889_v55 = vadd.f32 %v1843_v10, %v4201_v25 }
 0x2c8   : > { %v2758_v58 = vadd.f32 %v4272_v32, %v2722_v56 }
 0x2c9   : > { %v2119_v29 = vpop.f32.mrf.mxu2 }
 0x2ca   : > { %vm2790_vm12 = vcmp.ge.f32.partialorder %v2758_v58, 0.0  ;;  %v2822_v53 = vmul.f32 0.2, %v2758_v58  ;;  %v2167_v19 = vadd.f32 %v2119_v29, %v1888_v41  ;;  %v2397_v2 = vpop.f32.mrf.mxu3  ;;  %v2678_v14 = vpop.f32.mrf.mxu0 }
 0x2cc   : > { %v2854_v42 = vsel %vm2790_vm12, %v2758_v58, %v2822_v53  ;;  %v2445_v37 = vadd.f32 %v2397_v2, %v2167_v19 }
 0x2cd   : > { %2887 = vst.msk [vmem:[%s4288_s15 + $0xb8] sm:$0xff] %vm2863_vm4, %v2854_v42  ;;  %v1846_v62 = vpop.f32.mrf.mxu1 }
 0x2ce   : > { %v2723_v59 = vadd.f32 %v2675_v61, %v2445_v37  ;;  %v1890_v44 = vadd.f32 %v1846_v62, %v4211_v20 }
 0x2d0   : > { %v2759_v38 = vadd.f32 %v4272_v32, %v2723_v59 }
 0x2d1   : > { %v2122_v45 = vpop.f32.mrf.mxu2 }
 0x2d2   : > { %vm2791_vm13 = vcmp.ge.f32.partialorder %v2759_v38, 0.0  ;;  %v2823_v40 = vmul.f32 0.2, %v2759_v38  ;;  %v2168_v43 = vadd.f32 %v2122_v45, %v1889_v55  ;;  %v2400_v50 = vpop.f32.mrf.mxu3  ;;  %v2681_v60 = vpop.f32.mrf.mxu0 }
 0x2d4   : > { %v2855_v35 = vsel %vm2791_vm13, %v2759_v38, %v2823_v40  ;;  %v2446_v21 = vadd.f32 %v2400_v50, %v2168_v43 }
 0x2d5   : > { %2888 = vst.msk [vmem:[%s4288_s15 + $0xc0] sm:$0xff] %vm2863_vm4, %v2855_v35  ;;  %v1849_v16 = vpop.f32.mrf.mxu1 }
 0x2d6   : > { %v2724_v36 = vadd.f32 %v2678_v14, %v2446_v21  ;;  %v1891_v3 = vadd.f32 %v1849_v16, %v4221_v23 }
 0x2d8   : > { %v2760_v57 = vadd.f32 %v4272_v32, %v2724_v36 }
 0x2d9   : > { %v2125_v25 = vpop.f32.mrf.mxu2 }
 0x2da   : > { %vm2792_vm14 = vcmp.ge.f32.partialorder %v2760_v57, 0.0  ;;  %v2824_v34 = vmul.f32 0.2, %v2760_v57  ;;  %v2169_v46 = vadd.f32 %v2125_v25, %v1890_v44  ;;  %v2403_v63 = vpop.f32.mrf.mxu3  ;;  %v2684_v4 = vpop.f32.mrf.mxu0 }
 0x2dc   : > { %v2856_v48 = vsel %vm2792_vm14, %v2760_v57, %v2824_v34  ;;  %v2447_v1 = vadd.f32 %v2403_v63, %v2169_v46 }
 0x2dd   : > { %2889 = vst.msk [vmem:[%s4288_s15 + $0xc8] sm:$0xff] %vm2863_vm4, %v2856_v48  ;;  %v1852_v24 = vpop.f32.mrf.mxu1 }
 0x2de   : > { %v2725_v39 = vadd.f32 %v2681_v60, %v2447_v1  ;;  %v1892_v6 = vadd.f32 %v1852_v24, %v4231_v0 }
 0x2e0   : > { %v2761_v7 = vadd.f32 %v4272_v32, %v2725_v39 }
 0x2e1   : > { %v2128_v20 = vpop.f32.mrf.mxu2 }
 0x2e2   : > { %vm2793_vm15 = vcmp.ge.f32.partialorder %v2761_v7, 0.0  ;;  %v2825_v47 = vmul.f32 0.2, %v2761_v7  ;;  %v2170_v28 = vadd.f32 %v2128_v20, %v1891_v3  ;;  %v2406_v22 = vpop.f32.mrf.mxu3  ;;  %v2687_v49 = vpop.f32.mrf.mxu0 }
 0x2e4   : > { %v2857_v33 = vsel %vm2793_vm15, %v2761_v7, %v2825_v47  ;;  %v2448_v15 = vadd.f32 %v2406_v22, %v2170_v28 }
 0x2e5   : > { %2890 = vst.msk [vmem:[%s4288_s15 + $0xd0] sm:$0xff] %vm2863_vm4, %v2857_v33  ;;  %v1855_v23 = vpop.f32.mrf.mxu1 }
 0x2e6   : > { %v2726_v31 = vadd.f32 %v2684_v4, %v2448_v15  ;;  %v1893_v61 = vadd.f32 %v1855_v23, %v4241_v30 }
 0x2e8   : > { %v2762_v27 = vadd.f32 %v4272_v32, %v2726_v31 }
 0x2e9   : > { %v2131_v8 = vpop.f32.mrf.mxu2 }
 0x2ea   : > { %vm2794_vm0 = vcmp.ge.f32.partialorder %v2762_v27, 0.0  ;;  %v2826_v9 = vmul.f32 0.2, %v2762_v27  ;;  %v2171_v51 = vadd.f32 %v2131_v8, %v1892_v6  ;;  %v2409_v5 = vpop.f32.mrf.mxu3  ;;  %v2690_v54 = vpop.f32.mrf.mxu0 }
 0x2ec   : > { %v2858_v13 = vsel %vm2794_vm0, %v2762_v27, %v2826_v9  ;;  %v2449_v11 = vadd.f32 %v2409_v5, %v2171_v51 }
 0x2ed   : > { %2891 = vst.msk [vmem:[%s4288_s15 + $0xd8] sm:$0xff] %vm2863_vm4, %v2858_v13  ;;  %v1858_v41 = vpop.f32.mrf.mxu1 }
 0x2ee   : > { %v2727_v17 = vadd.f32 %v2687_v49, %v2449_v11  ;;  %v1894_v19 = vadd.f32 %v1858_v41, %v4251_v52 }
 0x2f0   : > { %v2763_v12 = vadd.f32 %v4272_v32, %v2727_v17 }
 0x2f1   : > { %v2134_v0 = vpop.f32.mrf.mxu2 }
 0x2f2   : > { %vm2795_vm2 = vcmp.ge.f32.partialorder %v2763_v12, 0.0  ;;  %v2827_v26 = vmul.f32 0.2, %v2763_v12  ;;  %v2172_v10 = vadd.f32 %v2134_v0, %v1893_v61  ;;  %v2412_v56 = vpop.f32.mrf.mxu3  ;;  %v2693_v30 = vpop.f32.mrf.mxu0 }
 0x2f4   : > { %v2859_v58 = vsel %vm2795_vm2, %v2763_v12, %v2827_v26  ;;  %v2450_v29 = vadd.f32 %v2412_v56, %v2172_v10 }
 0x2f5   : > { %2892 = vst.msk [vmem:[%s4288_s15 + $0xe0] sm:$0xff] %vm2863_vm4, %v2859_v58  ;;  %v1861_v38 = vpop.f32.mrf.mxu1 }
 0x2f6   : > { %v2728_v53 = vadd.f32 %v2690_v54, %v2450_v29  ;;  %v1895_v40 = vadd.f32 %v1861_v38, %v4261_v18 }
 0x2f8   : > { %v2764_v2 = vadd.f32 %v4272_v32, %v2728_v53 }
 0x2f9   : > { %v2137_v14 = vpop.f32.mrf.mxu2 }
 0x2fa   : > { %vm2796_vm3 = vcmp.ge.f32.partialorder %v2764_v2, 0.0  ;;  %v2828_v42 = vmul.f32 0.2, %v2764_v2  ;;  %v2173_v37 = vadd.f32 %v2137_v14, %v1894_v19  ;;  %v2415_v62 = vpop.f32.mrf.mxu3  ;;  %v2696_v21 = vpop.f32.mrf.mxu0 }
 0x2fc   : > { %v2860_v59 = vsel %vm2796_vm3, %v2764_v2, %v2828_v42  ;;  %v2451_v55 = vadd.f32 %v2415_v62, %v2173_v37 }
 0x2fd   : > { %2893 = vst.msk [vmem:[%s4288_s15 + $0xe8] sm:$0xff] %vm2863_vm4, %v2860_v59 }
 0x2fe   : > { %v2729_v45 = vadd.f32 %v2693_v30, %v2451_v55 }
 0x300   : > { %v2765_v52 = vadd.f32 %v4272_v32, %v2729_v45 }
 0x301   : > { %v2140_v43 = vpop.f32.mrf.mxu2 }
 0x302   : > { %vm2797_vm1 = vcmp.ge.f32.partialorder %v2765_v52, 0.0  ;;  %v2829_v50 = vmul.f32 0.2, %v2765_v52  ;;  %v2174_v60 = vadd.f32 %v2140_v43, %v1895_v40  ;;  %v2418_v35 = vpop.f32.mrf.mxu3 }
 0x304   : > { %v2861_v16 = vsel %vm2797_vm1, %v2765_v52, %v2829_v50  ;;  %v2452_v36 = vadd.f32 %v2418_v35, %v2174_v60 }
 0x305   : > { %2894 = vst.msk [vmem:[%s4288_s15 + $0xf0] sm:$0xff] %vm2863_vm4, %v2861_v16 }
 0x306   : > { %v2730_v44 = vadd.f32 %v2696_v21, %v2452_v36 }
 0x308   : > { %v2766_v57 = vadd.f32 %v4272_v32, %v2730_v44 }
 0x30a   : > { %vm2798_vm5 = vcmp.ge.f32.partialorder %v2766_v57, 0.0  ;;  %v2830_v25 = vmul.f32 0.2, %v2766_v57 }
 0x30c   : > { %v2862_v34 = vsel %vm2798_vm5, %v2766_v57, %v2830_v25 }
 0x30d   : > { %2895 = vst.msk [vmem:[%s4288_s15 + $0xf8] sm:$0xff] %vm2863_vm4, %v2862_v34 }
 0x30e PF: > { %s13_s12 = sadd.s32 1, %s3288_s12  }
 0x30f   : > { %p10_p4 = scmp.ge.s32.totalorder %s13_s12, 4  }
 0x311   :  { %12 = sbr.rel (!%p10_p4) target bundleno = 1 (0x1), region = 72 }

</bundles_post_ra>
